<compile_context>
chip_gen: v7x
topology: tpu7x:2x2x1
jax: 0.10.0
libtpu: 0.0.40
codegen_flags: <defaults>
</compile_context>

<pallas_src>
import functools
import math

import jax
import jax.numpy as jnp
from jax import lax
from jax.experimental import pallas as pl
from jax.experimental.pallas import tpu as pltpu


def _vmem_spec():
    return pl.BlockSpec(memory_space=pltpu.MemorySpace.VMEM)


def _smem_spec():
    return pl.BlockSpec(memory_space=pltpu.MemorySpace.SMEM)


# ----------------------------------------------------------------------------
# Fused forward kernel
# ----------------------------------------------------------------------------
def _longvae_kernel(
    # inputs
    x_flat_ref, evt_ref, eps_lbd_ref, eps_eta_ref, eps_tau_ref,
    lbd_w1, lbd_b1, lbd_w2, lbd_b2,
    wih0, whh0, b0, wih1, whh1, b1, wih2, whh2, b2,
    fc_w, fc_b, hlbd_w, hlbd_b, het_w, het_b,
    dec_w1, dec_b1, dec_w2, dec_b2,
    scal_ref,
    # outputs
    recon_ref, lbd_stats_ref, et_stats_ref, loss_ref,
    # scratch
    out_last_scr,
):
    f32 = jnp.float32
    BT, D = x_flat_ref.shape
    B = eps_eta_ref.shape[0]
    T = BT // B
    H = whh0.shape[0]
    Dm1 = D - 1

    x_flat = x_flat_ref[...]                                   # (B*T, D), row b*T+t = x[b, t, :]

    # ---- constant selection / expansion matrices, generated on the VPU ----
    row_b = lax.broadcasted_iota(jnp.int32, (B, BT), 0)
    col_bt = lax.broadcasted_iota(jnp.int32, (B, BT), 1)
    sel0 = (col_bt == row_b * T).astype(f32)                   # picks x[b, 0, :]
    selL = (col_bt == row_b * T + (T - 1)).astype(f32)         # picks x[b, T-1, :]

    erow = lax.broadcasted_iota(jnp.int32, (BT, B), 0)
    ecol = lax.broadcasted_iota(jnp.int32, (BT, B), 1)
    expand = jnp.logical_and(erow >= ecol * T,
                             erow < ecol * T + T).astype(f32)  # (BT, B): row b*T+t -> batch b

    # ---- fc_lbd MLP on x[:, 0, :]  +  fused lbd head ----
    x0 = jnp.dot(sel0, x_flat, preferred_element_type=f32)                         # (B, D)
    h = jnp.maximum(jnp.dot(x0, lbd_w1[...], preferred_element_type=f32) + lbd_b1[...], 0.0)
    fcl = jnp.maximum(jnp.dot(h, lbd_w2[...], preferred_element_type=f32) + lbd_b2[...], 0.0)

    lbd_stats = jnp.dot(fcl, hlbd_w[...], preferred_element_type=f32) + hlbd_b[...]  # (B, 2(D-1))
    mu_lbd = lbd_stats[:, :Dm1]
    lv_lbd = lbd_stats[:, Dm1:]
    lbd = mu_lbd + eps_lbd_ref[...] * jnp.exp(0.5 * lv_lbd)

    # ---- 3-layer tanh RNN (batch_first=False: seq axis = data batch B) ----
    # Only batch column T-1 is consumed downstream (out[:, -1, :]).
    x_last = jnp.dot(selL, x_flat, preferred_element_type=f32)                      # (B, D)
    # hoist the layer-0 input projection (and its bias) out of the recurrence
    xproj0 = jnp.dot(x_last, wih0[...], preferred_element_type=f32) + b0[...]       # (B, H)

    w_hh0 = whh0[...]
    w_ih1, w_hh1, bias1 = wih1[...], whh1[...], b1[...]
    w_ih2, w_hh2, bias2 = wih2[...], whh2[...], b2[...]

    h1 = jnp.zeros((1, H), f32)
    h2 = jnp.zeros((1, H), f32)
    h3 = jnp.zeros((1, H), f32)
    for s in range(B):                                          # static unroll (B is tiny)
        h1 = jnp.tanh(xproj0[s:s + 1, :]
                      + jnp.dot(h1, w_hh0, preferred_element_type=f32))
        h2 = jnp.tanh(jnp.dot(h1, w_ih1, preferred_element_type=f32)
                      + jnp.dot(h2, w_hh1, preferred_element_type=f32) + bias1)
        h3 = jnp.tanh(jnp.dot(h2, w_ih2, preferred_element_type=f32)
                      + jnp.dot(h3, w_hh2, preferred_element_type=f32) + bias2)
        out_last_scr[s:s + 1, :] = h3
    out_last = out_last_scr[...]                                # == rnn_out[:, -1, :]   (B, H)

    # ---- fc + fused eta/tau heads + reparameterized sampling ----
    fc_out = jnp.dot(out_last, fc_w[...], preferred_element_type=f32) + fc_b[...]   # (B, 128)
    et_stats = jnp.dot(fc_out, het_w[...], preferred_element_type=f32) + het_b[...] # (B, 4)
    mu_eta = et_stats[:, 0:1]
    lv_eta = et_stats[:, 1:2]
    mu_tau = et_stats[:, 2:3]
    lv_tau = et_stats[:, 3:4]
    eta = mu_eta + eps_eta_ref[...] * jnp.exp(0.5 * lv_eta)
    tau = mu_tau + eps_tau_ref[...] * jnp.exp(0.5 * lv_tau)

    # ---- l = exp(eta) * (eval_visit_time - tau); l_t = [l | broadcast(lbd)] ----
    eta_rep = jnp.dot(expand, eta, preferred_element_type=f32)                      # (BT, 1)
    tau_rep = jnp.dot(expand, tau, preferred_element_type=f32)                      # (BT, 1)
    l_flat = jnp.exp(eta_rep) * (evt_ref[...] - tau_rep)                            # (BT, 1)

    lane_d = lax.broadcasted_iota(jnp.int32, (1, D), 1)
    place0 = (lane_d == 0).astype(f32)                          # (1, D): drop l into column 0
    pr = lax.broadcasted_iota(jnp.int32, (Dm1, D), 0)
    pc = lax.broadcasted_iota(jnp.int32, (Dm1, D), 1)
    shift1 = (pc == pr + 1).astype(f32)                         # (D-1, D): lbd -> columns 1..D-1

    lbd_shift = jnp.dot(lbd, shift1, preferred_element_type=f32)                    # (B, D)
    l_t = (jnp.dot(l_flat, place0, preferred_element_type=f32)
           + jnp.dot(expand, lbd_shift, preferred_element_type=f32))                # (BT, D)

    # ---- decoder: Linear(D,512) -> ReLU -> Linear(512,D) ----
    dh = jnp.maximum(jnp.dot(l_t, dec_w1[...], preferred_element_type=f32) + dec_b1[...], 0.0)
    recon = jnp.dot(dh, dec_w2[...], preferred_element_type=f32) + dec_b2[...]      # (BT, D)

    # ---- loss: masked MSE (per-sample sum) + KLDs, mean over batch ----
    m = scal_ref[0]       # mask value
    pe = scal_ref[1]      # log_var_eta_prior
    pt = scal_ref[2]      # log_var_tau_prior
    beta = scal_ref[3]    # effective beta

    diff = m * recon - m * x_flat
    recon_sum = jnp.sum(diff * diff)                            # == sum_b recon_loss[b]
    kld_lbd = -0.5 * jnp.sum(1.0 + lv_lbd - mu_lbd * mu_lbd - jnp.exp(lv_lbd))
    kld_eta = -0.5 * jnp.sum(1.0 + lv_eta - pe
                             - (mu_eta * mu_eta + jnp.exp(lv_eta)) / jnp.exp(pe))
    kld_tau = -0.5 * jnp.sum(1.0 + lv_tau - pt
                             - (mu_tau * mu_tau + jnp.exp(lv_tau)) / jnp.exp(pt))

    # ---- writebacks (packed, lane-dense-ish slabs; loss as SMEM scalar) ----
    recon_ref[...] = recon
    lbd_stats_ref[...] = lbd_stats
    et_stats_ref[...] = et_stats
    loss_ref[0, 0] = (recon_sum + beta * (kld_lbd + kld_eta + kld_tau)) / B


def _forward_call(x_flat, evt_flat, eps_lbd, eps_eta, eps_tau, params, scal):
    BT, D = x_flat.shape
    B = eps_eta.shape[0]
    Dm1 = D - 1
    H = params["rnn_whh0"].shape[0]

    inputs = [
        x_flat, evt_flat, eps_lbd, eps_eta, eps_tau,
        params["fc_lbd_w1"], params["fc_lbd_b1"], params["fc_lbd_w2"], params["fc_lbd_b2"],
        params["rnn_wih0"], params["rnn_whh0"], params["rnn_b0"],
        params["rnn_wih1"], params["rnn_whh1"], params["rnn_b1"],
        params["rnn_wih2"], params["rnn_whh2"], params["rnn_b2"],
        params["fc_w"], params["fc_b"],
        params["head_lbd_w"], params["head_lbd_b"],
        params["head_et_w"], params["head_et_b"],
        params["dec_w1"], params["dec_b1"], params["dec_w2"], params["dec_b2"],
        scal,
    ]
    out_shapes = (
        jax.ShapeDtypeStruct((BT, D), jnp.float32),        # recon_x
        jax.ShapeDtypeStruct((B, 2 * Dm1), jnp.float32),   # [mu_lbd | log_var_lbd]
        jax.ShapeDtypeStruct((B, 4), jnp.float32),         # [mu_eta, lv_eta, mu_tau, lv_tau]
        jax.ShapeDtypeStruct((1, 1), jnp.float32),         # loss
    )
    return pl.pallas_call(
        _longvae_kernel,
        out_shape=out_shapes,
        in_specs=[_vmem_spec()] * (len(inputs) - 1) + [_smem_spec()],
        out_specs=(_vmem_spec(), _vmem_spec(), _vmem_spec(), _smem_spec()),
        scratch_shapes=[pltpu.VMEM((B, H), jnp.float32)],
    )(*inputs)


# ----------------------------------------------------------------------------
# Parameter init (deterministic; PyTorch-style uniform(-1/sqrt(fan_in), ...))
# Linear weights are stored pre-transposed: shape (in_features, out_features).
# Head weights are packed (concatenated along the output axis) for one-matmul
# head projections in the kernel.
# ----------------------------------------------------------------------------
def linear_init(key, fan_in, fan_out):
    kw, kb = jax.random.split(key)
    bound = 1.0 / math.sqrt(fan_in)
    w = jax.random.uniform(kw, (fan_in, fan_out), jnp.float32, -bound, bound)
    b = jax.random.uniform(kb, (1, fan_out), jnp.float32, -bound, bound)
    return w, b


def rnn_layer_init(key, in_dim, H):
    k1, k2, k3, k4 = jax.random.split(key, 4)
    bound = 1.0 / math.sqrt(H)
    wih = jax.random.uniform(k1, (in_dim, H), jnp.float32, -bound, bound)
    whh = jax.random.uniform(k2, (H, H), jnp.float32, -bound, bound)
    bih = jax.random.uniform(k3, (1, H), jnp.float32, -bound, bound)
    bhh = jax.random.uniform(k4, (1, H), jnp.float32, -bound, bound)
    return wih, whh, bih + bhh   # combined bias (b_ih + b_hh)


def init_params(key, D, H):
    ks = iter(jax.random.split(key, 16))
    p = {}
    p["fc_lbd_w1"], p["fc_lbd_b1"] = linear_init(next(ks), D, 512)
    p["fc_lbd_w2"], p["fc_lbd_b2"] = linear_init(next(ks), 512, 128)
    p["fc_w"], p["fc_b"] = linear_init(next(ks), H, 128)
    mu_lbd_w, mu_lbd_b = linear_init(next(ks), 128, D - 1)
    lv_lbd_w, lv_lbd_b = linear_init(next(ks), 128, D - 1)
    mu_eta_w, mu_eta_b = linear_init(next(ks), 128, 1)
    lv_eta_w, lv_eta_b = linear_init(next(ks), 128, 1)
    mu_tau_w, mu_tau_b = linear_init(next(ks), 128, 1)
    lv_tau_w, lv_tau_b = linear_init(next(ks), 128, 1)
    p["head_lbd_w"] = jnp.concatenate([mu_lbd_w, lv_lbd_w], axis=1)          # (128, 2(D-1))
    p["head_lbd_b"] = jnp.concatenate([mu_lbd_b, lv_lbd_b], axis=1)
    p["head_et_w"] = jnp.concatenate([mu_eta_w, lv_eta_w, mu_tau_w, lv_tau_w], axis=1)  # (128, 4)
    p["head_et_b"] = jnp.concatenate([mu_eta_b, lv_eta_b, mu_tau_b, lv_tau_b], axis=1)
    p["dec_w1"], p["dec_b1"] = linear_init(next(ks), D, 512)
    p["dec_w2"], p["dec_b2"] = linear_init(next(ks), 512, D)
    p["rnn_wih0"], p["rnn_whh0"], p["rnn_b0"] = rnn_layer_init(next(ks), D, H)
    p["rnn_wih1"], p["rnn_whh1"], p["rnn_b1"] = rnn_layer_init(next(ks), H, H)
    p["rnn_wih2"], p["rnn_whh2"], p["rnn_b2"] = rnn_layer_init(next(ks), H, H)
    return p


# ----------------------------------------------------------------------------
# Full forward pass (varying_length = False branch)
# ----------------------------------------------------------------------------
@functools.partial(jax.jit,
                   static_argnames=("beta", "longvae_priors", "epoch",
                                    "warmup_epoch", "mask_val"))
def longvae_forward(params, x, eps_lbd, eps_eta, eps_tau, *,
                    beta=1.0, longvae_priors=1.0, epoch=0, warmup_epoch=0,
                    mask_val=1.0):
    B, T, D = x.shape
    BT = B * T
    Dm1 = D - 1

    x_flat = x.reshape(BT, D)                                   # row b*T+t = x[b, t, :]
    # eval_visit_time = visit_time = linspace(0, 1, n_steps), replicated per b
    evt_flat = jnp.tile(jnp.linspace(0.0, 1.0, T, dtype=jnp.float32), B).reshape(BT, 1)

    lv_prior = math.log(float(longvae_priors))
    beta_eff = min(beta, beta * epoch / (warmup_epoch + 1))
    scal = jnp.array([mask_val, lv_prior, lv_prior, beta_eff], jnp.float32)

    recon_x, lbd_stats, et_stats, loss2 = _forward_call(
        x_flat, evt_flat, eps_lbd, eps_eta, eps_tau, params, scal)

    # Mirrors the ModelOutput keys of the PyTorch module (incl. its key quirk)
    return {
        "loss": loss2[0, 0],
        "recon_x": recon_x,
        "mu_lbd": lbd_stats[:, :Dm1],
        "log_var_lbd": lbd_stats[:, Dm1:],
        "mu_eta": et_stats[:, 0:1],
        "log_var_eta": et_stats[:, 1:2],
        "mu_tau": et_stats[:, 2:3],
        "logvar_eta": et_stats[:, 3:4],   # quirk: this key holds log_var_tau
    }


# ----------------------------------------------------------------------------
if __name__ == "__main__":
    # small config: batch=4, n_steps=8, latent_dim=8, hidden=32
    B, T, D, H = 4, 8, 8, 32

    key = jax.random.PRNGKey(0)
    k_x, k_p, k_e1, k_e2, k_e3 = jax.random.split(key, 5)

    x = jax.random.normal(k_x, (B, T, D), jnp.float32)
    params = init_params(k_p, D, H)

    # eps for the reparameterization trick (torch.randn_like equivalents)
    eps_lbd = jax.random.normal(k_e1, (B, D - 1), jnp.float32)
    eps_eta = jax.random.normal(k_e2, (B, 1), jnp.float32)
    eps_tau = jax.random.normal(k_e3, (B, 1), jnp.float32)

    out = longvae_forward(params, x, eps_lbd, eps_eta, eps_tau,
                          beta=1.0, longvae_priors=1.0,
                          epoch=0, warmup_epoch=0, mask_val=1.0)
    out = jax.block_until_ready(out)

    assert out["recon_x"].shape == (B * T, D)
    assert out["mu_lbd"].shape == (B, D - 1)
    assert out["log_var_lbd"].shape == (B, D - 1)
    assert out["mu_eta"].shape == (B, 1)
    assert out["mu_tau"].shape == (B, 1)
    assert bool(jnp.isfinite(out["loss"]))

    print("KERNEL_OK")
</pallas_src>

<mosaic_0001>
module attributes {stable_mosaic.version = 11 : i64} {
  func.func @_longvae_kernel(%arg0: memref<32x8xf32, #tpu.memory_space<vmem>>, %arg1: memref<32x1xf32, #tpu.memory_space<vmem>>, %arg2: memref<4x7xf32, #tpu.memory_space<vmem>>, %arg3: memref<4x1xf32, #tpu.memory_space<vmem>>, %arg4: memref<4x1xf32, #tpu.memory_space<vmem>>, %arg5: memref<8x512xf32, #tpu.memory_space<vmem>>, %arg6: memref<1x512xf32, #tpu.memory_space<vmem>>, %arg7: memref<512x128xf32, #tpu.memory_space<vmem>>, %arg8: memref<1x128xf32, #tpu.memory_space<vmem>>, %arg9: memref<8x32xf32, #tpu.memory_space<vmem>>, %arg10: memref<32x32xf32, #tpu.memory_space<vmem>>, %arg11: memref<1x32xf32, #tpu.memory_space<vmem>>, %arg12: memref<32x32xf32, #tpu.memory_space<vmem>>, %arg13: memref<32x32xf32, #tpu.memory_space<vmem>>, %arg14: memref<1x32xf32, #tpu.memory_space<vmem>>, %arg15: memref<32x32xf32, #tpu.memory_space<vmem>>, %arg16: memref<32x32xf32, #tpu.memory_space<vmem>>, %arg17: memref<1x32xf32, #tpu.memory_space<vmem>>, %arg18: memref<32x128xf32, #tpu.memory_space<vmem>>, %arg19: memref<1x128xf32, #tpu.memory_space<vmem>>, %arg20: memref<128x14xf32, #tpu.memory_space<vmem>>, %arg21: memref<1x14xf32, #tpu.memory_space<vmem>>, %arg22: memref<128x4xf32, #tpu.memory_space<vmem>>, %arg23: memref<1x4xf32, #tpu.memory_space<vmem>>, %arg24: memref<8x512xf32, #tpu.memory_space<vmem>>, %arg25: memref<1x512xf32, #tpu.memory_space<vmem>>, %arg26: memref<512x8xf32, #tpu.memory_space<vmem>>, %arg27: memref<1x8xf32, #tpu.memory_space<vmem>>, %arg28: memref<4xf32, #tpu.memory_space<smem>>, %arg29: memref<32x8xf32, #tpu.memory_space<vmem>>, %arg30: memref<4x14xf32, #tpu.memory_space<vmem>>, %arg31: memref<4x4xf32, #tpu.memory_space<vmem>>, %arg32: memref<1x1xf32, #tpu.memory_space<smem>>, %arg33: memref<4x32xf32, #tpu.memory_space<vmem>>) attributes {dimension_semantics = [], scalar_prefetch = 0 : i64, scratch_operands = 1 : i64, tpu.core_type = #tpu.core_type<tc>} {
    %c0 = arith.constant 0 : index
    %c0_0 = arith.constant 0 : index
    %0 = vector.load %arg0[%c0, %c0_0] : memref<32x8xf32, #tpu.memory_space<vmem>>, vector<32x8xf32>
    %1 = tpu.iota {dimensions = array<i32: 0>} : vector<4x32xi32>
    %2 = tpu.iota {dimensions = array<i32: 1>} : vector<4x32xi32>
    %c8_i32 = arith.constant 8 : i32
    %3 = vector.broadcast %c8_i32 : i32 to vector<4x32xi32>
    %4 = arith.muli %1, %3 : vector<4x32xi32>
    %5 = arith.cmpi eq, %2, %4 : vector<4x32xi32>
    %6 = arith.extui %5 : vector<4x32xi1> to vector<4x32xi32>
    %7 = arith.sitofp %6 : vector<4x32xi32> to vector<4x32xf32>
    %c8_i32_1 = arith.constant 8 : i32
    %8 = vector.broadcast %c8_i32_1 : i32 to vector<4x32xi32>
    %9 = arith.muli %1, %8 : vector<4x32xi32>
    %c7_i32 = arith.constant 7 : i32
    %10 = vector.broadcast %c7_i32 : i32 to vector<4x32xi32>
    %11 = arith.addi %9, %10 : vector<4x32xi32>
    %12 = arith.cmpi eq, %2, %11 : vector<4x32xi32>
    %13 = arith.extui %12 : vector<4x32xi1> to vector<4x32xi32>
    %14 = arith.sitofp %13 : vector<4x32xi32> to vector<4x32xf32>
    %15 = tpu.iota {dimensions = array<i32: 0>} : vector<32x4xi32>
    %16 = tpu.iota {dimensions = array<i32: 1>} : vector<32x4xi32>
    %c8_i32_2 = arith.constant 8 : i32
    %17 = vector.broadcast %c8_i32_2 : i32 to vector<32x4xi32>
    %18 = arith.muli %16, %17 : vector<32x4xi32>
    %19 = arith.cmpi sge, %15, %18 : vector<32x4xi32>
    %c8_i32_3 = arith.constant 8 : i32
    %20 = vector.broadcast %c8_i32_3 : i32 to vector<32x4xi32>
    %21 = arith.muli %16, %20 : vector<32x4xi32>
    %c8_i32_4 = arith.constant 8 : i32
    %22 = vector.broadcast %c8_i32_4 : i32 to vector<32x4xi32>
    %23 = arith.addi %21, %22 : vector<32x4xi32>
    %24 = arith.cmpi slt, %15, %23 : vector<32x4xi32>
    %25 = arith.andi %19, %24 : vector<32x4xi1>
    %26 = arith.extui %25 : vector<32x4xi1> to vector<32x4xi32>
    %27 = arith.sitofp %26 : vector<32x4xi32> to vector<32x4xf32>
    %cst = arith.constant dense<0.000000e+00> : vector<4x8xf32>
    %28 = tpu.matmul %7, %0, %cst {dimension_numbers = #tpu.dot_dimension_numbers<[1], [0], [0], [1], [0, 0, 1, 1], [], []>} : vector<4x32xf32>, vector<32x8xf32>, vector<4x8xf32> -> vector<4x8xf32>
    %c0_5 = arith.constant 0 : index
    %c0_6 = arith.constant 0 : index
    %29 = vector.load %arg5[%c0_5, %c0_6] : memref<8x512xf32, #tpu.memory_space<vmem>>, vector<8x512xf32>
    %cst_7 = arith.constant dense<0.000000e+00> : vector<4x512xf32>
    %30 = tpu.matmul %28, %29, %cst_7 {dimension_numbers = #tpu.dot_dimension_numbers<[1], [0], [0], [1], [0, 0, 1, 1], [], []>} : vector<4x8xf32>, vector<8x512xf32>, vector<4x512xf32> -> vector<4x512xf32>
    %c0_8 = arith.constant 0 : index
    %c0_9 = arith.constant 0 : index
    %31 = vector.load %arg6[%c0_8, %c0_9] : memref<1x512xf32, #tpu.memory_space<vmem>>, vector<1x512xf32>
    %32 = vector.broadcast %31 : vector<1x512xf32> to vector<4x512xf32>
    %33 = arith.addf %30, %32 : vector<4x512xf32>
    %cst_10 = arith.constant 0.000000e+00 : f32
    %34 = vector.broadcast %cst_10 : f32 to vector<4x512xf32>
    %35 = arith.maximumf %33, %34 : vector<4x512xf32>
    %c0_11 = arith.constant 0 : index
    %c0_12 = arith.constant 0 : index
    %36 = vector.load %arg7[%c0_11, %c0_12] : memref<512x128xf32, #tpu.memory_space<vmem>>, vector<512x128xf32>
    %cst_13 = arith.constant dense<0.000000e+00> : vector<4x128xf32>
    %37 = tpu.matmul %35, %36, %cst_13 {dimension_numbers = #tpu.dot_dimension_numbers<[1], [0], [0], [1], [0, 0, 1, 1], [], []>} : vector<4x512xf32>, vector<512x128xf32>, vector<4x128xf32> -> vector<4x128xf32>
    %c0_14 = arith.constant 0 : index
    %c0_15 = arith.constant 0 : index
    %38 = vector.load %arg8[%c0_14, %c0_15] : memref<1x128xf32, #tpu.memory_space<vmem>>, vector<1x128xf32>
    %39 = vector.broadcast %38 : vector<1x128xf32> to vector<4x128xf32>
    %40 = arith.addf %37, %39 : vector<4x128xf32>
    %cst_16 = arith.constant 0.000000e+00 : f32
    %41 = vector.broadcast %cst_16 : f32 to vector<4x128xf32>
    %42 = arith.maximumf %40, %41 : vector<4x128xf32>
    %c0_17 = arith.constant 0 : index
    %c0_18 = arith.constant 0 : index
    %43 = vector.load %arg20[%c0_17, %c0_18] : memref<128x14xf32, #tpu.memory_space<vmem>>, vector<128x14xf32>
    %cst_19 = arith.constant dense<0.000000e+00> : vector<4x14xf32>
    %44 = tpu.matmul %42, %43, %cst_19 {dimension_numbers = #tpu.dot_dimension_numbers<[1], [0], [0], [1], [0, 0, 1, 1], [], []>} : vector<4x128xf32>, vector<128x14xf32>, vector<4x14xf32> -> vector<4x14xf32>
    %c0_20 = arith.constant 0 : index
    %c0_21 = arith.constant 0 : index
    %45 = vector.load %arg21[%c0_20, %c0_21] : memref<1x14xf32, #tpu.memory_space<vmem>>, vector<1x14xf32>
    %46 = vector.broadcast %45 : vector<1x14xf32> to vector<4x14xf32>
    %47 = arith.addf %44, %46 : vector<4x14xf32>
    %48 = vector.extract_strided_slice %47 {offsets = [0, 0], sizes = [4, 7], strides = [1, 1]} : vector<4x14xf32> to vector<4x7xf32>
    %49 = vector.extract_strided_slice %47 {offsets = [0, 7], sizes = [4, 7], strides = [1, 1]} : vector<4x14xf32> to vector<4x7xf32>
    %c0_22 = arith.constant 0 : index
    %c0_23 = arith.constant 0 : index
    %50 = vector.load %arg2[%c0_22, %c0_23] : memref<4x7xf32, #tpu.memory_space<vmem>>, vector<4x7xf32>
    %cst_24 = arith.constant 5.000000e-01 : f32
    %51 = vector.broadcast %cst_24 : f32 to vector<4x7xf32>
    %52 = arith.mulf %51, %49 : vector<4x7xf32>
    %53 = math.exp %52 : vector<4x7xf32>
    %54 = arith.mulf %50, %53 : vector<4x7xf32>
    %55 = arith.addf %48, %54 : vector<4x7xf32>
    %cst_25 = arith.constant dense<0.000000e+00> : vector<4x8xf32>
    %56 = tpu.matmul %14, %0, %cst_25 {dimension_numbers = #tpu.dot_dimension_numbers<[1], [0], [0], [1], [0, 0, 1, 1], [], []>} : vector<4x32xf32>, vector<32x8xf32>, vector<4x8xf32> -> vector<4x8xf32>
    %c0_26 = arith.constant 0 : index
    %c0_27 = arith.constant 0 : index
    %57 = vector.load %arg9[%c0_26, %c0_27] : memref<8x32xf32, #tpu.memory_space<vmem>>, vector<8x32xf32>
    %cst_28 = arith.constant dense<0.000000e+00> : vector<4x32xf32>
    %58 = tpu.matmul %56, %57, %cst_28 {dimension_numbers = #tpu.dot_dimension_numbers<[1], [0], [0], [1], [0, 0, 1, 1], [], []>} : vector<4x8xf32>, vector<8x32xf32>, vector<4x32xf32> -> vector<4x32xf32>
    %c0_29 = arith.constant 0 : index
    %c0_30 = arith.constant 0 : index
    %59 = vector.load %arg11[%c0_29, %c0_30] : memref<1x32xf32, #tpu.memory_space<vmem>>, vector<1x32xf32>
    %60 = vector.broadcast %59 : vector<1x32xf32> to vector<4x32xf32>
    %61 = arith.addf %58, %60 : vector<4x32xf32>
    %c0_31 = arith.constant 0 : index
    %c0_32 = arith.constant 0 : index
    %62 = vector.load %arg10[%c0_31, %c0_32] : memref<32x32xf32, #tpu.memory_space<vmem>>, vector<32x32xf32>
    %c0_33 = arith.constant 0 : index
    %c0_34 = arith.constant 0 : index
    %63 = vector.load %arg12[%c0_33, %c0_34] : memref<32x32xf32, #tpu.memory_space<vmem>>, vector<32x32xf32>
    %c0_35 = arith.constant 0 : index
    %c0_36 = arith.constant 0 : index
    %64 = vector.load %arg13[%c0_35, %c0_36] : memref<32x32xf32, #tpu.memory_space<vmem>>, vector<32x32xf32>
    %c0_37 = arith.constant 0 : index
    %c0_38 = arith.constant 0 : index
    %65 = vector.load %arg14[%c0_37, %c0_38] : memref<1x32xf32, #tpu.memory_space<vmem>>, vector<1x32xf32>
    %c0_39 = arith.constant 0 : index
    %c0_40 = arith.constant 0 : index
    %66 = vector.load %arg15[%c0_39, %c0_40] : memref<32x32xf32, #tpu.memory_space<vmem>>, vector<32x32xf32>
    %c0_41 = arith.constant 0 : index
    %c0_42 = arith.constant 0 : index
    %67 = vector.load %arg16[%c0_41, %c0_42] : memref<32x32xf32, #tpu.memory_space<vmem>>, vector<32x32xf32>
    %c0_43 = arith.constant 0 : index
    %c0_44 = arith.constant 0 : index
    %68 = vector.load %arg17[%c0_43, %c0_44] : memref<1x32xf32, #tpu.memory_space<vmem>>, vector<1x32xf32>
    %cst_45 = arith.constant 0.000000e+00 : f32
    %69 = vector.broadcast %cst_45 : f32 to vector<1x32xf32>
    %cst_46 = arith.constant 0.000000e+00 : f32
    %70 = vector.broadcast %cst_46 : f32 to vector<1x32xf32>
    %cst_47 = arith.constant 0.000000e+00 : f32
    %71 = vector.broadcast %cst_47 : f32 to vector<1x32xf32>
    %72 = vector.extract_strided_slice %61 {offsets = [0, 0], sizes = [1, 32], strides = [1, 1]} : vector<4x32xf32> to vector<1x32xf32>
    %cst_48 = arith.constant dense<0.000000e+00> : vector<1x32xf32>
    %73 = tpu.matmul %69, %62, %cst_48 {dimension_numbers = #tpu.dot_dimension_numbers<[1], [0], [0], [1], [0, 0, 1, 1], [], []>} : vector<1x32xf32>, vector<32x32xf32>, vector<1x32xf32> -> vector<1x32xf32>
    %74 = arith.addf %72, %73 : vector<1x32xf32>
    %75 = math.tanh %74 : vector<1x32xf32>
    %cst_49 = arith.constant dense<0.000000e+00> : vector<1x32xf32>
    %76 = tpu.matmul %75, %63, %cst_49 {dimension_numbers = #tpu.dot_dimension_numbers<[1], [0], [0], [1], [0, 0, 1, 1], [], []>} : vector<1x32xf32>, vector<32x32xf32>, vector<1x32xf32> -> vector<1x32xf32>
    %cst_50 = arith.constant dense<0.000000e+00> : vector<1x32xf32>
    %77 = tpu.matmul %70, %64, %cst_50 {dimension_numbers = #tpu.dot_dimension_numbers<[1], [0], [0], [1], [0, 0, 1, 1], [], []>} : vector<1x32xf32>, vector<32x32xf32>, vector<1x32xf32> -> vector<1x32xf32>
    %78 = arith.addf %76, %77 : vector<1x32xf32>
    %79 = arith.addf %78, %65 : vector<1x32xf32>
    %80 = math.tanh %79 : vector<1x32xf32>
    %cst_51 = arith.constant dense<0.000000e+00> : vector<1x32xf32>
    %81 = tpu.matmul %80, %66, %cst_51 {dimension_numbers = #tpu.dot_dimension_numbers<[1], [0], [0], [1], [0, 0, 1, 1], [], []>} : vector<1x32xf32>, vector<32x32xf32>, vector<1x32xf32> -> vector<1x32xf32>
    %cst_52 = arith.constant dense<0.000000e+00> : vector<1x32xf32>
    %82 = tpu.matmul %71, %67, %cst_52 {dimension_numbers = #tpu.dot_dimension_numbers<[1], [0], [0], [1], [0, 0, 1, 1], [], []>} : vector<1x32xf32>, vector<32x32xf32>, vector<1x32xf32> -> vector<1x32xf32>
    %83 = arith.addf %81, %82 : vector<1x32xf32>
    %84 = arith.addf %83, %68 : vector<1x32xf32>
    %85 = math.tanh %84 : vector<1x32xf32>
    %c0_53 = arith.constant 0 : index
    %c0_54 = arith.constant 0 : index
    %86 = vector.load %arg33[%c0_53, %c0_54] : memref<4x32xf32, #tpu.memory_space<vmem>>, vector<1x32xf32>
    tpu.vector_store %arg33[%c0_53, %c0_54], %85 {strides = array<i32>} : memref<4x32xf32, #tpu.memory_space<vmem>>, vector<1x32xf32>,
    %87 = vector.extract_strided_slice %61 {offsets = [1, 0], sizes = [1, 32], strides = [1, 1]} : vector<4x32xf32> to vector<1x32xf32>
    %cst_55 = arith.constant dense<0.000000e+00> : vector<1x32xf32>
    %88 = tpu.matmul %75, %62, %cst_55 {dimension_numbers = #tpu.dot_dimension_numbers<[1], [0], [0], [1], [0, 0, 1, 1], [], []>} : vector<1x32xf32>, vector<32x32xf32>, vector<1x32xf32> -> vector<1x32xf32>
    %89 = arith.addf %87, %88 : vector<1x32xf32>
    %90 = math.tanh %89 : vector<1x32xf32>
    %cst_56 = arith.constant dense<0.000000e+00> : vector<1x32xf32>
    %91 = tpu.matmul %90, %63, %cst_56 {dimension_numbers = #tpu.dot_dimension_numbers<[1], [0], [0], [1], [0, 0, 1, 1], [], []>} : vector<1x32xf32>, vector<32x32xf32>, vector<1x32xf32> -> vector<1x32xf32>
    %cst_57 = arith.constant dense<0.000000e+00> : vector<1x32xf32>
    %92 = tpu.matmul %80, %64, %cst_57 {dimension_numbers = #tpu.dot_dimension_numbers<[1], [0], [0], [1], [0, 0, 1, 1], [], []>} : vector<1x32xf32>, vector<32x32xf32>, vector<1x32xf32> -> vector<1x32xf32>
    %93 = arith.addf %91, %92 : vector<1x32xf32>
    %94 = arith.addf %93, %65 : vector<1x32xf32>
    %95 = math.tanh %94 : vector<1x32xf32>
    %cst_58 = arith.constant dense<0.000000e+00> : vector<1x32xf32>
    %96 = tpu.matmul %95, %66, %cst_58 {dimension_numbers = #tpu.dot_dimension_numbers<[1], [0], [0], [1], [0, 0, 1, 1], [], []>} : vector<1x32xf32>, vector<32x32xf32>, vector<1x32xf32> -> vector<1x32xf32>
    %cst_59 = arith.constant dense<0.000000e+00> : vector<1x32xf32>
    %97 = tpu.matmul %85, %67, %cst_59 {dimension_numbers = #tpu.dot_dimension_numbers<[1], [0], [0], [1], [0, 0, 1, 1], [], []>} : vector<1x32xf32>, vector<32x32xf32>, vector<1x32xf32> -> vector<1x32xf32>
    %98 = arith.addf %96, %97 : vector<1x32xf32>
    %99 = arith.addf %98, %68 : vector<1x32xf32>
    %100 = math.tanh %99 : vector<1x32xf32>
    %c1 = arith.constant 1 : index
    %c0_60 = arith.constant 0 : index
    %101 = vector.load %arg33[%c1, %c0_60] : memref<4x32xf32, #tpu.memory_space<vmem>>, vector<1x32xf32>
    tpu.vector_store %arg33[%c1, %c0_60], %100 {strides = array<i32>} : memref<4x32xf32, #tpu.memory_space<vmem>>, vector<1x32xf32>,
    %102 = vector.extract_strided_slice %61 {offsets = [2, 0], sizes = [1, 32], strides = [1, 1]} : vector<4x32xf32> to vector<1x32xf32>
    %cst_61 = arith.constant dense<0.000000e+00> : vector<1x32xf32>
    %103 = tpu.matmul %90, %62, %cst_61 {dimension_numbers = #tpu.dot_dimension_numbers<[1], [0], [0], [1], [0, 0, 1, 1], [], []>} : vector<1x32xf32>, vector<32x32xf32>, vector<1x32xf32> -> vector<1x32xf32>
    %104 = arith.addf %102, %103 : vector<1x32xf32>
    %105 = math.tanh %104 : vector<1x32xf32>
    %cst_62 = arith.constant dense<0.000000e+00> : vector<1x32xf32>
    %106 = tpu.matmul %105, %63, %cst_62 {dimension_numbers = #tpu.dot_dimension_numbers<[1], [0], [0], [1], [0, 0, 1, 1], [], []>} : vector<1x32xf32>, vector<32x32xf32>, vector<1x32xf32> -> vector<1x32xf32>
    %cst_63 = arith.constant dense<0.000000e+00> : vector<1x32xf32>
    %107 = tpu.matmul %95, %64, %cst_63 {dimension_numbers = #tpu.dot_dimension_numbers<[1], [0], [0], [1], [0, 0, 1, 1], [], []>} : vector<1x32xf32>, vector<32x32xf32>, vector<1x32xf32> -> vector<1x32xf32>
    %108 = arith.addf %106, %107 : vector<1x32xf32>
    %109 = arith.addf %108, %65 : vector<1x32xf32>
    %110 = math.tanh %109 : vector<1x32xf32>
    %cst_64 = arith.constant dense<0.000000e+00> : vector<1x32xf32>
    %111 = tpu.matmul %110, %66, %cst_64 {dimension_numbers = #tpu.dot_dimension_numbers<[1], [0], [0], [1], [0, 0, 1, 1], [], []>} : vector<1x32xf32>, vector<32x32xf32>, vector<1x32xf32> -> vector<1x32xf32>
    %cst_65 = arith.constant dense<0.000000e+00> : vector<1x32xf32>
    %112 = tpu.matmul %100, %67, %cst_65 {dimension_numbers = #tpu.dot_dimension_numbers<[1], [0], [0], [1], [0, 0, 1, 1], [], []>} : vector<1x32xf32>, vector<32x32xf32>, vector<1x32xf32> -> vector<1x32xf32>
    %113 = arith.addf %111, %112 : vector<1x32xf32>
    %114 = arith.addf %113, %68 : vector<1x32xf32>
    %115 = math.tanh %114 : vector<1x32xf32>
    %c2 = arith.constant 2 : index
    %c0_66 = arith.constant 0 : index
    %116 = vector.load %arg33[%c2, %c0_66] : memref<4x32xf32, #tpu.memory_space<vmem>>, vector<1x32xf32>
    tpu.vector_store %arg33[%c2, %c0_66], %115 {strides = array<i32>} : memref<4x32xf32, #tpu.memory_space<vmem>>, vector<1x32xf32>,
    %117 = vector.extract_strided_slice %61 {offsets = [3, 0], sizes = [1, 32], strides = [1, 1]} : vector<4x32xf32> to vector<1x32xf32>
    %cst_67 = arith.constant dense<0.000000e+00> : vector<1x32xf32>
    %118 = tpu.matmul %105, %62, %cst_67 {dimension_numbers = #tpu.dot_dimension_numbers<[1], [0], [0], [1], [0, 0, 1, 1], [], []>} : vector<1x32xf32>, vector<32x32xf32>, vector<1x32xf32> -> vector<1x32xf32>
    %119 = arith.addf %117, %118 : vector<1x32xf32>
    %120 = math.tanh %119 : vector<1x32xf32>
    %cst_68 = arith.constant dense<0.000000e+00> : vector<1x32xf32>
    %121 = tpu.matmul %120, %63, %cst_68 {dimension_numbers = #tpu.dot_dimension_numbers<[1], [0], [0], [1], [0, 0, 1, 1], [], []>} : vector<1x32xf32>, vector<32x32xf32>, vector<1x32xf32> -> vector<1x32xf32>
    %cst_69 = arith.constant dense<0.000000e+00> : vector<1x32xf32>
    %122 = tpu.matmul %110, %64, %cst_69 {dimension_numbers = #tpu.dot_dimension_numbers<[1], [0], [0], [1], [0, 0, 1, 1], [], []>} : vector<1x32xf32>, vector<32x32xf32>, vector<1x32xf32> -> vector<1x32xf32>
    %123 = arith.addf %121, %122 : vector<1x32xf32>
    %124 = arith.addf %123, %65 : vector<1x32xf32>
    %125 = math.tanh %124 : vector<1x32xf32>
    %cst_70 = arith.constant dense<0.000000e+00> : vector<1x32xf32>
    %126 = tpu.matmul %125, %66, %cst_70 {dimension_numbers = #tpu.dot_dimension_numbers<[1], [0], [0], [1], [0, 0, 1, 1], [], []>} : vector<1x32xf32>, vector<32x32xf32>, vector<1x32xf32> -> vector<1x32xf32>
    %cst_71 = arith.constant dense<0.000000e+00> : vector<1x32xf32>
    %127 = tpu.matmul %115, %67, %cst_71 {dimension_numbers = #tpu.dot_dimension_numbers<[1], [0], [0], [1], [0, 0, 1, 1], [], []>} : vector<1x32xf32>, vector<32x32xf32>, vector<1x32xf32> -> vector<1x32xf32>
    %128 = arith.addf %126, %127 : vector<1x32xf32>
    %129 = arith.addf %128, %68 : vector<1x32xf32>
    %130 = math.tanh %129 : vector<1x32xf32>
    %c3 = arith.constant 3 : index
    %c0_72 = arith.constant 0 : index
    %131 = vector.load %arg33[%c3, %c0_72] : memref<4x32xf32, #tpu.memory_space<vmem>>, vector<1x32xf32>
    tpu.vector_store %arg33[%c3, %c0_72], %130 {strides = array<i32>} : memref<4x32xf32, #tpu.memory_space<vmem>>, vector<1x32xf32>,
    %c0_73 = arith.constant 0 : index
    %c0_74 = arith.constant 0 : index
    %132 = vector.load %arg33[%c0_73, %c0_74] : memref<4x32xf32, #tpu.memory_space<vmem>>, vector<4x32xf32>
    %c0_75 = arith.constant 0 : index
    %c0_76 = arith.constant 0 : index
    %133 = vector.load %arg18[%c0_75, %c0_76] : memref<32x128xf32, #tpu.memory_space<vmem>>, vector<32x128xf32>
    %cst_77 = arith.constant dense<0.000000e+00> : vector<4x128xf32>
    %134 = tpu.matmul %132, %133, %cst_77 {dimension_numbers = #tpu.dot_dimension_numbers<[1], [0], [0], [1], [0, 0, 1, 1], [], []>} : vector<4x32xf32>, vector<32x128xf32>, vector<4x128xf32> -> vector<4x128xf32>
    %c0_78 = arith.constant 0 : index
    %c0_79 = arith.constant 0 : index
    %135 = vector.load %arg19[%c0_78, %c0_79] : memref<1x128xf32, #tpu.memory_space<vmem>>, vector<1x128xf32>
    %136 = vector.broadcast %135 : vector<1x128xf32> to vector<4x128xf32>
    %137 = arith.addf %134, %136 : vector<4x128xf32>
    %c0_80 = arith.constant 0 : index
    %c0_81 = arith.constant 0 : index
    %138 = vector.load %arg22[%c0_80, %c0_81] : memref<128x4xf32, #tpu.memory_space<vmem>>, vector<128x4xf32>
    %cst_82 = arith.constant dense<0.000000e+00> : vector<4x4xf32>
    %139 = tpu.matmul %137, %138, %cst_82 {dimension_numbers = #tpu.dot_dimension_numbers<[1], [0], [0], [1], [0, 0, 1, 1], [], []>} : vector<4x128xf32>, vector<128x4xf32>, vector<4x4xf32> -> vector<4x4xf32>
    %c0_83 = arith.constant 0 : index
    %c0_84 = arith.constant 0 : index
    %140 = vector.load %arg23[%c0_83, %c0_84] : memref<1x4xf32, #tpu.memory_space<vmem>>, vector<1x4xf32>
    %141 = vector.broadcast %140 : vector<1x4xf32> to vector<4x4xf32>
    %142 = arith.addf %139, %141 : vector<4x4xf32>
    %143 = vector.extract_strided_slice %142 {offsets = [0, 0], sizes = [4, 1], strides = [1, 1]} : vector<4x4xf32> to vector<4x1xf32>
    %144 = vector.extract_strided_slice %142 {offsets = [0, 1], sizes = [4, 1], strides = [1, 1]} : vector<4x4xf32> to vector<4x1xf32>
    %145 = vector.extract_strided_slice %142 {offsets = [0, 2], sizes = [4, 1], strides = [1, 1]} : vector<4x4xf32> to vector<4x1xf32>
    %146 = vector.extract_strided_slice %142 {offsets = [0, 3], sizes = [4, 1], strides = [1, 1]} : vector<4x4xf32> to vector<4x1xf32>
    %c0_85 = arith.constant 0 : index
    %c0_86 = arith.constant 0 : index
    %147 = vector.load %arg3[%c0_85, %c0_86] : memref<4x1xf32, #tpu.memory_space<vmem>>, vector<4x1xf32>
    %cst_87 = arith.constant 5.000000e-01 : f32
    %148 = vector.broadcast %cst_87 : f32 to vector<4x1xf32>
    %149 = arith.mulf %148, %144 : vector<4x1xf32>
    %150 = math.exp %149 : vector<4x1xf32>
    %151 = arith.mulf %147, %150 : vector<4x1xf32>
    %152 = arith.addf %143, %151 : vector<4x1xf32>
    %c0_88 = arith.constant 0 : index
    %c0_89 = arith.constant 0 : index
    %153 = vector.load %arg4[%c0_88, %c0_89] : memref<4x1xf32, #tpu.memory_space<vmem>>, vector<4x1xf32>
    %cst_90 = arith.constant 5.000000e-01 : f32
    %154 = vector.broadcast %cst_90 : f32 to vector<4x1xf32>
    %155 = arith.mulf %154, %146 : vector<4x1xf32>
    %156 = math.exp %155 : vector<4x1xf32>
    %157 = arith.mulf %153, %156 : vector<4x1xf32>
    %158 = arith.addf %145, %157 : vector<4x1xf32>
    %cst_91 = arith.constant dense<0.000000e+00> : vector<32x1xf32>
    %159 = tpu.matmul %27, %152, %cst_91 {dimension_numbers = #tpu.dot_dimension_numbers<[1], [0], [0], [1], [0, 0, 1, 1], [], []>} : vector<32x4xf32>, vector<4x1xf32>, vector<32x1xf32> -> vector<32x1xf32>
    %cst_92 = arith.constant dense<0.000000e+00> : vector<32x1xf32>
    %160 = tpu.matmul %27, %158, %cst_92 {dimension_numbers = #tpu.dot_dimension_numbers<[1], [0], [0], [1], [0, 0, 1, 1], [], []>} : vector<32x4xf32>, vector<4x1xf32>, vector<32x1xf32> -> vector<32x1xf32>
    %161 = math.exp %159 : vector<32x1xf32>
    %c0_93 = arith.constant 0 : index
    %c0_94 = arith.constant 0 : index
    %162 = vector.load %arg1[%c0_93, %c0_94] : memref<32x1xf32, #tpu.memory_space<vmem>>, vector<32x1xf32>
    %163 = arith.subf %162, %160 : vector<32x1xf32>
    %164 = arith.mulf %161, %163 : vector<32x1xf32>
    %165 = tpu.iota {dimensions = array<i32: 1>} : vector<1x8xi32>
    %c0_i32 = arith.constant 0 : i32
    %166 = vector.broadcast %c0_i32 : i32 to vector<1x8xi32>
    %167 = arith.cmpi eq, %165, %166 : vector<1x8xi32>
    %168 = arith.extui %167 : vector<1x8xi1> to vector<1x8xi32>
    %169 = arith.sitofp %168 : vector<1x8xi32> to vector<1x8xf32>
    %170 = tpu.iota {dimensions = array<i32: 0>} : vector<7x8xi32>
    %171 = tpu.iota {dimensions = array<i32: 1>} : vector<7x8xi32>
    %c1_i32 = arith.constant 1 : i32
    %172 = vector.broadcast %c1_i32 : i32 to vector<7x8xi32>
    %173 = arith.addi %170, %172 : vector<7x8xi32>
    %174 = arith.cmpi eq, %171, %173 : vector<7x8xi32>
    %175 = arith.extui %174 : vector<7x8xi1> to vector<7x8xi32>
    %176 = arith.sitofp %175 : vector<7x8xi32> to vector<7x8xf32>
    %cst_95 = arith.constant dense<0.000000e+00> : vector<4x8xf32>
    %177 = tpu.matmul %55, %176, %cst_95 {dimension_numbers = #tpu.dot_dimension_numbers<[1], [0], [0], [1], [0, 0, 1, 1], [], []>} : vector<4x7xf32>, vector<7x8xf32>, vector<4x8xf32> -> vector<4x8xf32>
    %cst_96 = arith.constant dense<0.000000e+00> : vector<32x8xf32>
    %178 = tpu.matmul %164, %169, %cst_96 {dimension_numbers = #tpu.dot_dimension_numbers<[1], [0], [0], [1], [0, 0, 1, 1], [], []>} : vector<32x1xf32>, vector<1x8xf32>, vector<32x8xf32> -> vector<32x8xf32>
    %cst_97 = arith.constant dense<0.000000e+00> : vector<32x8xf32>
    %179 = tpu.matmul %27, %177, %cst_97 {dimension_numbers = #tpu.dot_dimension_numbers<[1], [0], [0], [1], [0, 0, 1, 1], [], []>} : vector<32x4xf32>, vector<4x8xf32>, vector<32x8xf32> -> vector<32x8xf32>
    %180 = arith.addf %178, %179 : vector<32x8xf32>
    %c0_98 = arith.constant 0 : index
    %c0_99 = arith.constant 0 : index
    %181 = vector.load %arg24[%c0_98, %c0_99] : memref<8x512xf32, #tpu.memory_space<vmem>>, vector<8x512xf32>
    %cst_100 = arith.constant dense<0.000000e+00> : vector<32x512xf32>
    %182 = tpu.matmul %180, %181, %cst_100 {dimension_numbers = #tpu.dot_dimension_numbers<[1], [0], [0], [1], [0, 0, 1, 1], [], []>} : vector<32x8xf32>, vector<8x512xf32>, vector<32x512xf32> -> vector<32x512xf32>
    %c0_101 = arith.constant 0 : index
    %c0_102 = arith.constant 0 : index
    %183 = vector.load %arg25[%c0_101, %c0_102] : memref<1x512xf32, #tpu.memory_space<vmem>>, vector<1x512xf32>
    %184 = vector.broadcast %183 : vector<1x512xf32> to vector<32x512xf32>
    %185 = arith.addf %182, %184 : vector<32x512xf32>
    %cst_103 = arith.constant 0.000000e+00 : f32
    %186 = vector.broadcast %cst_103 : f32 to vector<32x512xf32>
    %187 = arith.maximumf %185, %186 : vector<32x512xf32>
    %c0_104 = arith.constant 0 : index
    %c0_105 = arith.constant 0 : index
    %188 = vector.load %arg26[%c0_104, %c0_105] : memref<512x8xf32, #tpu.memory_space<vmem>>, vector<512x8xf32>
    %cst_106 = arith.constant dense<0.000000e+00> : vector<32x8xf32>
    %189 = tpu.matmul %187, %188, %cst_106 {dimension_numbers = #tpu.dot_dimension_numbers<[1], [0], [0], [1], [0, 0, 1, 1], [], []>} : vector<32x512xf32>, vector<512x8xf32>, vector<32x8xf32> -> vector<32x8xf32>
    %c0_107 = arith.constant 0 : index
    %c0_108 = arith.constant 0 : index
    %190 = vector.load %arg27[%c0_107, %c0_108] : memref<1x8xf32, #tpu.memory_space<vmem>>, vector<1x8xf32>
    %191 = vector.broadcast %190 : vector<1x8xf32> to vector<32x8xf32>
    %192 = arith.addf %189, %191 : vector<32x8xf32>
    %c0_109 = arith.constant 0 : index
    %193 = memref.load %arg28[%c0_109] : memref<4xf32, #tpu.memory_space<smem>>
    %c1_110 = arith.constant 1 : index
    %194 = memref.load %arg28[%c1_110] : memref<4xf32, #tpu.memory_space<smem>>
    %c2_111 = arith.constant 2 : index
    %195 = memref.load %arg28[%c2_111] : memref<4xf32, #tpu.memory_space<smem>>
    %c3_112 = arith.constant 3 : index
    %196 = memref.load %arg28[%c3_112] : memref<4xf32, #tpu.memory_space<smem>>
    %197 = vector.broadcast %193 : f32 to vector<32x8xf32>
    %198 = arith.mulf %197, %192 : vector<32x8xf32>
    %199 = vector.broadcast %193 : f32 to vector<32x8xf32>
    %200 = arith.mulf %199, %0 : vector<32x8xf32>
    %201 = arith.subf %198, %200 : vector<32x8xf32>
    %202 = arith.mulf %201, %201 : vector<32x8xf32>
    %203 = vector.shape_cast %202 : vector<32x8xf32> to vector<1x32x8xf32>
    %cst_113 = arith.constant dense<0.000000e+00> : vector<1xf32>
    %204 = vector.multi_reduction <add>, %203, %cst_113 [1, 2] : vector<1x32x8xf32> to vector<1xf32>
    %205 = vector.shape_cast %204 : vector<1xf32> to vector<1x1x1xf32>
    %206 = vector.extract %205[0, 0, 0] : f32 from vector<1x1x1xf32>
    %cst_114 = arith.constant 1.000000e+00 : f32
    %207 = vector.broadcast %cst_114 : f32 to vector<4x7xf32>
    %208 = arith.addf %207, %49 : vector<4x7xf32>
    %209 = arith.mulf %48, %48 : vector<4x7xf32>
    %210 = arith.subf %208, %209 : vector<4x7xf32>
    %211 = math.exp %49 : vector<4x7xf32>
    %212 = arith.subf %210, %211 : vector<4x7xf32>
    %213 = vector.shape_cast %212 : vector<4x7xf32> to vector<1x4x7xf32>
    %cst_115 = arith.constant dense<0.000000e+00> : vector<1xf32>
    %214 = vector.multi_reduction <add>, %213, %cst_115 [1, 2] : vector<1x4x7xf32> to vector<1xf32>
    %215 = vector.shape_cast %214 : vector<1xf32> to vector<1x1x1xf32>
    %216 = vector.extract %215[0, 0, 0] : f32 from vector<1x1x1xf32>
    %cst_116 = arith.constant -5.000000e-01 : f32
    %217 = arith.mulf %cst_116, %216 : f32
    %cst_117 = arith.constant 1.000000e+00 : f32
    %218 = vector.broadcast %cst_117 : f32 to vector<4x1xf32>
    %219 = arith.addf %218, %144 : vector<4x1xf32>
    %220 = vector.broadcast %194 : f32 to vector<4x1xf32>
    %221 = arith.subf %219, %220 : vector<4x1xf32>
    %222 = arith.mulf %143, %143 : vector<4x1xf32>
    %223 = math.exp %144 : vector<4x1xf32>
    %224 = arith.addf %222, %223 : vector<4x1xf32>
    %225 = math.exp %194 : f32
    %226 = vector.broadcast %225 : f32 to vector<4x1xf32>
    %227 = arith.divf %224, %226 : vector<4x1xf32>
    %228 = arith.subf %221, %227 : vector<4x1xf32>
    %229 = vector.shape_cast %228 : vector<4x1xf32> to vector<1x4x1xf32>
    %cst_118 = arith.constant dense<0.000000e+00> : vector<1xf32>
    %230 = vector.multi_reduction <add>, %229, %cst_118 [1, 2] : vector<1x4x1xf32> to vector<1xf32>
    %231 = vector.shape_cast %230 : vector<1xf32> to vector<1x1x1xf32>
    %232 = vector.extract %231[0, 0, 0] : f32 from vector<1x1x1xf32>
    %cst_119 = arith.constant -5.000000e-01 : f32
    %233 = arith.mulf %cst_119, %232 : f32
    %cst_120 = arith.constant 1.000000e+00 : f32
    %234 = vector.broadcast %cst_120 : f32 to vector<4x1xf32>
    %235 = arith.addf %234, %146 : vector<4x1xf32>
    %236 = vector.broadcast %195 : f32 to vector<4x1xf32>
    %237 = arith.subf %235, %236 : vector<4x1xf32>
    %238 = arith.mulf %145, %145 : vector<4x1xf32>
    %239 = math.exp %146 : vector<4x1xf32>
    %240 = arith.addf %238, %239 : vector<4x1xf32>
    %241 = math.exp %195 : f32
    %242 = vector.broadcast %241 : f32 to vector<4x1xf32>
    %243 = arith.divf %240, %242 : vector<4x1xf32>
    %244 = arith.subf %237, %243 : vector<4x1xf32>
    %245 = vector.shape_cast %244 : vector<4x1xf32> to vector<1x4x1xf32>
    %cst_121 = arith.constant dense<0.000000e+00> : vector<1xf32>
    %246 = vector.multi_reduction <add>, %245, %cst_121 [1, 2] : vector<1x4x1xf32> to vector<1xf32>
    %247 = vector.shape_cast %246 : vector<1xf32> to vector<1x1x1xf32>
    %248 = vector.extract %247[0, 0, 0] : f32 from vector<1x1x1xf32>
    %cst_122 = arith.constant -5.000000e-01 : f32
    %249 = arith.mulf %cst_122, %248 : f32
    %c0_123 = arith.constant 0 : index
    %c0_124 = arith.constant 0 : index
    %250 = vector.load %arg29[%c0_123, %c0_124] : memref<32x8xf32, #tpu.memory_space<vmem>>, vector<32x8xf32>
    tpu.vector_store %arg29[%c0_123, %c0_124], %192 {strides = array<i32>} : memref<32x8xf32, #tpu.memory_space<vmem>>, vector<32x8xf32>,
    %c0_125 = arith.constant 0 : index
    %c0_126 = arith.constant 0 : index
    %251 = vector.load %arg30[%c0_125, %c0_126] : memref<4x14xf32, #tpu.memory_space<vmem>>, vector<4x14xf32>
    tpu.vector_store %arg30[%c0_125, %c0_126], %47 {strides = array<i32>} : memref<4x14xf32, #tpu.memory_space<vmem>>, vector<4x14xf32>,
    %c0_127 = arith.constant 0 : index
    %c0_128 = arith.constant 0 : index
    %252 = vector.load %arg31[%c0_127, %c0_128] : memref<4x4xf32, #tpu.memory_space<vmem>>, vector<4x4xf32>
    tpu.vector_store %arg31[%c0_127, %c0_128], %142 {strides = array<i32>} : memref<4x4xf32, #tpu.memory_space<vmem>>, vector<4x4xf32>,
    %253 = arith.addf %217, %233 : f32
    %254 = arith.addf %253, %249 : f32
    %255 = arith.mulf %196, %254 : f32
    %256 = arith.addf %206, %255 : f32
    %cst_129 = arith.constant 4.000000e+00 : f32
    %257 = arith.divf %256, %cst_129 : f32
    %c0_130 = arith.constant 0 : index
    %c0_131 = arith.constant 0 : index
    %258 = memref.load %arg32[%c0_130, %c0_131] : memref<1x1xf32, #tpu.memory_space<smem>>
    memref.store %257, %arg32[%c0_130, %c0_131] : memref<1x1xf32, #tpu.memory_space<smem>>
    return
  }
}

</mosaic_0001>

<bundles_post_ra>
// kernel: tile.8
= control target key start
LH: loop header
LB: loop body
LE: loop exit
PB: predicated region body
PF: predicated region fallthrough
CT: control target
= control target key end

     0   :  { %s22_s0 = inlined_call_operand.vmem [shape: f32[8], index: 0, kind: input, shape index: {}]   ;;  %s23_s1 = inlined_call_operand.vmem [shape: f32[4,8], index: 1, kind: output, shape index: {}]  }
   0x1   :  { %v4_v0 = vld [vmem:[%s22_s0] ss:$0 sm:$0xff] }
   0x2   :  { %5 = vst [vmem:[%s23_s1] sm:$0xf] %v4_v0 }

// kernel: tile.0
= control target key start
LH: loop header
LB: loop body
LE: loop exit
PB: predicated region body
PF: predicated region fallthrough
CT: control target
= control target key end

     0   :  { %s66_s8 = smov 125   ;;  %vm7_vm0 = vcmask 7168   ;;  %s67_s11 = smov 126   ;;  %s117_s0 = inlined_call_operand.vmem [shape: f32[4,8], index: 0, kind: input, shape index: {}]   ;;  %s118_s1 = inlined_call_operand.vmem [shape: f32[32,1], index: 1, kind: output, shape index: {}]  }
   0x1   :  { %v4_v0 = vld [vmem:[%s117_s0] sm:$0xf]  ;;  %s65_s0 = smov 127   ;;  %s68_s12 = smov 124  }
   0x2   :  { %5 = vst [vmem:[#allocation0] sm:$0xf] %v4_v0  ;;  %s69_s13 = smov 123   ;;  %s70_s14 = smov 122  }
   0x3   :  { %s71_s15 = smov 121  }
   0x9   :  { %v9_v1 = vld [vmem:[#allocation0] sm:$0xf]  }
   0xa   :  { %v21_v2 = vld [vmem:[#allocation0] sm:$0xf]   ;;  %10 = vrot.lane.b32.xlu0 %v9_v1, %s65_s0 }
   0xb   :  { %22 = vrot.lane.b32.xlu1 %v21_v2, %s66_s8  ;;  %v15_v3 = vld [vmem:[#allocation0] sm:$0xf]  }
   0xc   :  { %v27_v4 = vld [vmem:[#allocation0] sm:$0xf]  }
   0xd   :  { %v6_v5 = vld [vmem:[#allocation0] sm:$0xf]  }
   0xe   :  { %8 = vst.msk [vmem:[%s118_s1] ss:$8 sm:$0xf] %vm7_vm0, %v6_v5   ;;  %16 = vrot.lane.b32.xlu0 %v15_v3, %s67_s11  ;;  %v33_v6 = vld [vmem:[#allocation0] sm:$0xf]  }
   0xf   :  { %28 = vrot.lane.b32.xlu1 %v27_v4, %s68_s12  ;;  %v39_v7 = vld [vmem:[#allocation0] sm:$0xf]  }
  0x10   :  { %v45_v8 = vld [vmem:[#allocation0] sm:$0xf]  }
  0x12   :  { %34 = vrot.lane.b32.xlu0 %v33_v6, %s69_s13 }
  0x13   :  { %40 = vrot.lane.b32.xlu1 %v39_v7, %s70_s14 }
  0x16   :  { %46 = vrot.lane.b32.xlu0 %v45_v8, %s71_s15 }
  0x7c   :  { %v11_v9 = vpop.permute.xlu0 %10  }
  0x7d   :  { %v23_v10 = vpop.permute.xlu1 %22   ;;  %51 = vst.msk [vmem:[%s118_s1 + $0x1] ss:$8 sm:$0xf] %vm7_vm0, %v11_v9  }
  0x7e   :  { %53 = vst.msk [vmem:[%s118_s1 + $0x3] ss:$8 sm:$0xf] %vm7_vm0, %v23_v10  }
  0x80   :  { %v17_v11 = vpop.permute.xlu0 %16  }
  0x81   :  { %v29_v12 = vpop.permute.xlu1 %28   ;;  %52 = vst.msk [vmem:[%s118_s1 + $0x2] ss:$8 sm:$0xf] %vm7_vm0, %v17_v11  }
  0x82   :  { %54 = vst.msk [vmem:[%s118_s1 + $0x4] ss:$8 sm:$0xf] %vm7_vm0, %v29_v12  }
  0x84   :  { %v35_v13 = vpop.permute.xlu0 %34  }
  0x85   :  { %v41_v14 = vpop.permute.xlu1 %40   ;;  %55 = vst.msk [vmem:[%s118_s1 + $0x5] ss:$8 sm:$0xf] %vm7_vm0, %v35_v13  }
  0x86   :  { %56 = vst.msk [vmem:[%s118_s1 + $0x6] ss:$8 sm:$0xf] %vm7_vm0, %v41_v14  }
  0x88   :  { %v47_v15 = vpop.permute.xlu0 %46  }
  0x89   :  { %57 = vst.msk [vmem:[%s118_s1 + $0x7] ss:$8 sm:$0xf] %vm7_vm0, %v47_v15  }

// kernel: longvae_forward.1
= control target key start
LH: loop header
LB: loop body
LE: loop exit
PB: predicated region body
PF: predicated region fallthrough
CT: control target
= control target key end

     0   :  { %s4984_s6 = smov 1   ;;  %s4985_s10 = smov 2   ;;  %s5804_s0 = inlined_call_operand.smem [shape: u32[33], index: -1, kind: input, shape index: {}] }
   0x1   :  { %s5036_s5 = sld [smem:[%s5804_s0]]   ;;  %s4986_s14 = smov 3  }
   0x2   :  { %s5041_s9 = sld [smem:[%s5804_s0 + %s4984_s6]]   ;;  %s4987_s18 = smov 4  }
   0x3   :  { %s5046_s13 = sld [smem:[%s5804_s0 + %s4985_s10]]   ;;  %s4988_s22 = smov 5  }
   0x4   :  { %s5051_s17 = sld [smem:[%s5804_s0 + %s4986_s14]]   ;;  %s4989_s26 = smov 6  }
   0x5   :  { %s5056_s21 = sld [smem:[%s5804_s0 + %s4987_s18]]   ;;  %s4990_s30 = smov 7  }
   0x6   :  { %s5061_s25 = sld [smem:[%s5804_s0 + %s4988_s22]]   ;;  %s4991_s4 = smov 8  }
   0x7   :  { %s5066_s29 = sld [smem:[%s5804_s0 + %s4989_s26]]   ;;  %s4992_s10 = smov 9  }
   0x8   :  { %5811 = sst [smem:[#allocation9_spill]] %s5041_s9  ;;  %s4993_s15 = smov 10  }
   0x9   :  { %5812 = sst [smem:[#allocation10_spill]] %s5046_s13  ;;  %s4994_s20 = smov 11  }
   0xa   :  { %5813 = sst [smem:[#allocation11_spill]] %s5051_s17  ;;  %s4995_s26 = smov 12  }
   0xb   :  { %5814 = sst [smem:[#allocation12_spill]] %s5056_s21  ;;  %s4996_s1 = smov 13  }
   0xc   :  { %s5071_s3 = sld [smem:[%s5804_s0 + %s4990_s30]]   ;;  %s4997_s7 = smov 14  }
   0xd   :  { %s5076_s8 = sld [smem:[%s5804_s0 + %s4991_s4]]   ;;  %s4999_s22 = smov 16  }
   0xe   :  { %s5081_s14 = sld [smem:[%s5804_s0 + %s4992_s10]]   ;;  %s5000_s28 = smov 17  }
   0xf   :  { %s5086_s19 = sld [smem:[%s5804_s0 + %s4993_s15]]   ;;  %s4998_s15 = smov 15  }
  0x10   :  { %s5091_s24 = sld [smem:[%s5804_s0 + %s4994_s20]]   ;;  %s5013_s10 = smov 30  }
  0x11   :  { %s5096_s30 = sld [smem:[%s5804_s0 + %s4995_s26]]   ;;  %s5014_s16 = smov 31  }
  0x12   :  { %s5101_s6 = sld [smem:[%s5804_s0 + %s4996_s1]]   ;;  %s5012_s1 = smov 29  }
  0x13   :  { %s5106_s12 = sld [smem:[%s5804_s0 + %s4997_s7]]   ;;  %s5001_s7 = smov 18  }
  0x14   :  { %s5111_s20 = sld [smem:[%s5804_s0 + %s4998_s15]]   ;;  %s5002_s15 = smov 19  }
  0x15   :  { %s5116_s27 = sld [smem:[%s5804_s0 + %s4999_s22]]   ;;  %s5003_s22 = smov 20  }
  0x16   :  { %s5121_s4 = sld [smem:[%s5804_s0 + %s5000_s28]]   ;;  %s5004_s28 = smov 21  }
  0x17   :  { %s5126_s9 = sld [smem:[%s5804_s0 + %s5001_s7]]   ;;  %s5005_s7 = smov 22  }
  0x18   :  { %s5131_s13 = sld [smem:[%s5804_s0 + %s5002_s15]]   ;;  %s5006_s15 = smov 23  }
  0x19   :  { %5815 = sst [smem:[#allocation13_spill]] %s5106_s12  ;;  %s5015_s23 = smov 32  }
  0x1a   :  { %5816 = sst [smem:[#allocation14_spill]] %s5111_s20 }
  0x1b   :  { %s5136_s21 = sld [smem:[%s5804_s0 + %s5003_s22]]   ;;  %s5007_s22 = smov 24  }
  0x1c   :  { %5817 = sst [smem:[#allocation15_spill]] %s5121_s4 }
  0x1d   :  { %5818 = sst [smem:[#allocation16_spill]] %s5126_s9 }
  0x1e   :  { %5819 = sst [smem:[#allocation17_spill]] %s5131_s13 }
  0x1f   :  { %s5141_s17 = sld [smem:[%s5804_s0 + %s5004_s28]]   ;;  %s5008_s28 = smov 25  }
  0x20   :  { %s5146_s9 = sld [smem:[%s5804_s0 + %s5005_s7]]   ;;  %s5009_s7 = smov 26  }
  0x21   :  { %s5151_s13 = sld [smem:[%s5804_s0 + %s5006_s15]]   ;;  %s5010_s15 = smov 27  }
  0x22   :  { %s5156_s4 = sld [smem:[%s5804_s0 + %s5007_s22]]   ;;  %s5011_s22 = smov 28  }
  0x23   :  { %s5161_s12 = sld [smem:[%s5804_s0 + %s5008_s28]]  }
  0x24   :  { %s5194_s20 = sld [smem:[%s5804_s0 + %s5015_s23]]  }
  0x26   :  { %5820 = sst [smem:[#allocation18_spill]] %s5146_s9 }
  0x27   :  { %5821 = sst [smem:[#allocation19_spill]] %s5151_s13 }
  0x28   :  { %5822 = sst [smem:[#allocation20_spill]] %s5156_s4 }
  0x29   :  { %5823 = sst [smem:[#allocation21_spill]] %s5161_s12 }
  0x2a   :  { %s5166_s9 = sld [smem:[%s5804_s0 + %s5009_s7]]  }
  0x2b   :  { %s5171_s13 = sld [smem:[%s5804_s0 + %s5010_s15]]  }
  0x2c   :  { %s3761_s4 = sld [smem:[%s5804_s0 + %s5011_s22]]  }
  0x2d   :  { %s5179_s12 = sld [smem:[%s5804_s0 + %s5012_s1]]  }
  0x30   :  { %5824 = sst [smem:[#allocation22_spill]] %s5166_s9 }
  0x31   :  { %5825 = sst [smem:[#allocation23_spill]] %s5171_s13 }
  0x32   :  { %s5184_s9 = sld [smem:[%s5804_s0 + %s5013_s10]]  }
  0x33   :  { %s5189_s13 = sld [smem:[%s5804_s0 + %s5014_s16]]  }
  0x34   :  { %71 = vsyncpa [#allocation5], 0 }
  0x35   :  { %72 = vsyncpa [#allocation4], 0  ;;  %s135_s1 = sshll.u32 %s3761_s4, 4  ;;  %s136_s1 = int_to_ptr.vmem [resolvable:$true] %s135_s1 }
  0x36   :  { %s4958_s28 = scalar_lea.vmem %s136_s1, 16  ;;  %p4963_p1 = scmp.lt.s32.totalorder %s136_s1, %s136_s1 }
  0x37   :  { %p4959_p0 = scmp.ne.s32.totalorder %s136_s1, %s4958_s28  ;;  %p4964_p2 = scmp.lt.s32.totalorder %s4958_s28, %s4958_s28 }
  0x39   :  { %p4965_p3 = por %p4964_p2, %p4963_p1 }
  0x3b   :  { %p4966_p4 = pnand %p4965_p3, %p4959_p0 }
  0x3d   :  { %4969 = shalt.err (!%p4966_p4)
}
  0x3e   :  { %s5016_s2 = smov [#allocation3]  }
  0x3f   :  { %138 = dma.vmem_to_smem %s136_s1, 16, %s5016_s2, [#allocation5]  }
  0x40   :  { %4980 = dma.done.wait [#allocation5], 16  }
  0x41   :  { %4981 = vsyncadd [#allocation5], 4294967280 }
  0x42   :  { %142 = sfence }
  0x43   :  { %v143_v0 = vld [vmem:[%s5036_s5] sm:$0xff]  ;;  %v144_v1 = vld [vmem:[%s5036_s5 + $0x8] sm:$0xff]  ;;  %v145_v2 = vld [vmem:[%s5036_s5 + $0x10] sm:$0xff]  ;;  %v147_v3 = vlaneseq  ;;  %v5017_v4 = vmov 0.0|0.0   ;;  %vm5018_vm0 = vmmov 0   ;;  %v5019_v8 = vmov 0.0  }
  0x44   :  { %4532 = vmatprep.subr.bf16.mxu0 %v5017_v4  ;;  %v5200_v5 = vpack.c.bf16 %v144_v1, %v143_v0  ;;  %v146_v6 = vld [vmem:[%s5036_s5 + $0x18] sm:$0xff]  ;;  %v259_v7 = vld [vmem:[%s5061_s25 + $0x8] sm:$0xff]  ;;  %4175 = vmatprep.mubr.msk.f32.mxu0 %vm5018_vm0, %v5019_v8  ;;  %vm184_vm2 = vcmask 261120   ;;  %v258_v14 = vld [vmem:[%s5061_s25] sm:$0xff]  ;;  %vm284_vm3 = vcmask 64512   ;;  %vm3695_vm5 = vcmask 109568  }
  0x45   :  { %v5206_v9 = vshrl.u32 %v147_v3, 7  ;;  %v5208_v10 = vand.u32 127, %v147_v3  ;;  %288 = vmatprep.subr.mxu1 %v259_v7  ;;  %v5211_v11 = vpack.c.bf16 %v146_v6, %v145_v2  ;;  %352 = vmatprep.mubr.f32.mxu1 %v5019_v8  ;;  %v261_v15 = vld [vmem:[%s5061_s25 + $0x18] sm:$0xff]  ;;  %v482_v16 = vld [vmem:[%s5071_s3 + $0x180] sm:$0xff]  ;;  %v483_v17 = vld [vmem:[%s5071_s3 + $0x188] sm:$0xff]  ;;  %s5826_s0 = sld [smem:[#allocation14_spill]] }
  0x46   :  { %4534 = vmatpush3.bf16.msra.mxu0 %v5200_v5  ;;  %289 = vmatpush1.msra.mxu1 %v258_v14  ;;  %v4570_v18 = vpack.c.bf16 %v483_v17, %v482_v16  ;;  %v466_v19 = vld [vmem:[%s5071_s3 + $0x100] sm:$0xff]  ;;  %v467_v20 = vld [vmem:[%s5071_s3 + $0x108] sm:$0xff]  ;;  %v484_v22 = vld [vmem:[%s5071_s3 + $0x190] sm:$0xff]  ;;  %vm1290_vm6 = vcmask 253952   ;;  %vm3697_vm7 = vcmask 27648   ;;  %vm2600_vm9 = vcmask 31744  }
  0x47   :  { %4535 = vmatprep.subr.bf16.mxu0 %v5017_v4  ;;  %v151_v12 = vmul.u32 8, %v5206_v9  ;;  %359 = vmatprep.subr.mxu1 %v261_v15  ;;  %v4572_v21 = vpack.c.bf16 %v467_v20, %v466_v19  ;;  %v485_v23 = vld [vmem:[%s5071_s3 + $0x198] sm:$0xff]  ;;  %v468_v25 = vld [vmem:[%s5071_s3 + $0x110] sm:$0xff]  ;;  %v486_v28 = vld [vmem:[%s5071_s3 + $0x1a0] sm:$0xff]  ;;  %s5025_s4 = smov 7   ;;  %s5836_s10 = sld [smem:[#allocation9_spill]] }
  0x48   :  { %v4574_v24 = vpack.c.bf16 %v485_v23, %v484_v22  ;;  %v469_v26 = vld [vmem:[%s5071_s3 + $0x118] sm:$0xff]  ;;  %v487_v29 = vld [vmem:[%s5071_s3 + $0x1a8] sm:$0xff]  ;;  %v470_v31 = vld [vmem:[%s5071_s3 + $0x120] sm:$0xff]  ;;  %s5837_s7 = sld [smem:[#allocation20_spill]]  ;;  %s5838_s11 = sld [smem:[#allocation22_spill]] }
  0x49   :  { %vm152_vm1 = vcmp.eq.s32.totalorder %v5208_v10, %v151_v12  ;;  %v4576_v27 = vpack.c.bf16 %v469_v26, %v468_v25  ;;  %v4578_v30 = vpack.c.bf16 %v487_v29, %v486_v28  ;;  %v471_v32 = vld [vmem:[%s5071_s3 + $0x128] sm:$0xff]  ;;  %v488_v34 = vld [vmem:[%s5071_s3 + $0x1b0] sm:$0xff]  ;;  %v489_v35 = vld [vmem:[%s5071_s3 + $0x1b8] sm:$0xff]  ;;  %s5839_s16 = sld [smem:[#allocation21_spill]]  ;;  %s5840_s15 = sld [smem:[#allocation23_spill]] }
  0x4a   :  { %4537 = vmatpush3.bf16.msra.mxu0 %v5211_v11  ;;  %v3766_v13 = vsel %vm152_vm1, 1.0, %v5019_v8  ;;  %v4580_v33 = vpack.c.bf16 %v471_v32, %v470_v31  ;;  %v4582_v36 = vpack.c.bf16 %v489_v35, %v488_v34  ;;  %v472_v37 = vld [vmem:[%s5071_s3 + $0x130] sm:$0xff]  ;;  %v473_v38 = vld [vmem:[%s5071_s3 + $0x138] sm:$0xff]  ;;  %v490_v40 = vld [vmem:[%s5071_s3 + $0x1c0] sm:$0xff]  ;;  %vm2613_vm1 = vcmask 1043456   ;;  %s3560_s18 = sld [smem:[#allocation3]] }
  0x4b   :  { %4571 = vmatprep.subr.bf16.mxu0 %v4570_v18  ;;  %v4584_v39 = vpack.c.bf16 %v473_v38, %v472_v37  ;;  %v491_v41 = vld [vmem:[%s5071_s3 + $0x1c8] sm:$0xff]  ;;  %v474_v43 = vld [vmem:[%s5071_s3 + $0x140] sm:$0xff]  ;;  %v492_v46 = vld [vmem:[%s5071_s3 + $0x1d0] sm:$0xff]  ;;  %s5026_s26 = smov 1   ;;  %s3834_s1 = sld [smem:[#allocation3 + $0x2]] }
  0x4c   :  { %v4586_v42 = vpack.c.bf16 %v491_v41, %v490_v40  ;;  %v475_v44 = vld [vmem:[%s5071_s3 + $0x148] sm:$0xff]  ;;  %v493_v47 = vld [vmem:[%s5071_s3 + $0x1d8] sm:$0xff]  ;;  %v450_v49 = vld [vmem:[%s5071_s3 + $0x80] sm:$0xff] }
  0x4d   :  { %4176 = vmatmul.mubr.msk.f32.vlgmr.msra.gmra.mrb[0].mxu0 %vm184_vm2, %v3766_v13  ;;  %v4588_v45 = vpack.c.bf16 %v475_v44, %v474_v43  ;;  %v4590_v48 = vpack.c.bf16 %v493_v47, %v492_v46  ;;  %v451_v50 = vld [vmem:[%s5071_s3 + $0x88] sm:$0xff]  ;;  %v260_v51 = vld [vmem:[%s5061_s25 + $0x10] sm:$0xff]  ;;  %v434_v53 = vld [vmem:[%s5071_s3] sm:$0xff]  ;;  %s5830_s25 = sld [smem:[#allocation18_spill]] }
  0x4e   :  { %4573 = vmatpush3.bf16.msra.mxu0 %v4572_v21  ;;  %v4538_v52 = vpack.c.bf16 %v451_v50, %v450_v49  ;;  %v435_v54 = vld [vmem:[%s5071_s3 + $0x8] sm:$0xff]  ;;  %v452_v56 = vld [vmem:[%s5071_s3 + $0x90] sm:$0xff]  ;;  %v453_v57 = vld [vmem:[%s5071_s3 + $0x98] sm:$0xff] }
  0x4f   :  { %4575 = vmatprep.subr.bf16.mxu0 %v4574_v24  ;;  %v4540_v59 = vpack.c.bf16 %v435_v54, %v434_v53  ;;  %v4542_v60 = vpack.c.bf16 %v453_v57, %v452_v56  ;;  %v436_v61 = vld [vmem:[%s5071_s3 + $0x10] sm:$0xff]  ;;  %v437_v62 = vld [vmem:[%s5071_s3 + $0x18] sm:$0xff]  ;;  %v454_v63 = vld [vmem:[%s5071_s3 + $0xa0] sm:$0xff] }
  0x50   :  { %v455_v0 = vld [vmem:[%s5071_s3 + $0xa8] sm:$0xff]  ;;  %v4544_v1 = vpack.c.bf16 %v437_v62, %v436_v61  ;;  %v438_v3 = vld [vmem:[%s5071_s3 + $0x20] sm:$0xff]  ;;  %v456_v7 = vld [vmem:[%s5071_s3 + $0xb0] sm:$0xff]  ;;  %v274_v62 = vsub.s32 2, %v5206_v9 }
  0x51   :  { %v4546_v2 = vpack.c.bf16 %v455_v0, %v454_v63  ;;  %v439_v6 = vld [vmem:[%s5071_s3 + $0x28] sm:$0xff]  ;;  %v457_v13 = vld [vmem:[%s5071_s3 + $0xb8] sm:$0xff]  ;;  %v440_v16 = vld [vmem:[%s5071_s3 + $0x30] sm:$0xff]  ;;  %v278_v0 = vsub.s32 3, %v5206_v9 }
  0x52   :  { %4577 = vmatpush3.bf16.msra.mxu0 %v4576_v27  ;;  %v4548_v14 = vpack.c.bf16 %v439_v6, %v438_v3  ;;  %v4550_v15 = vpack.c.bf16 %v457_v13, %v456_v7  ;;  %v441_v17 = vld [vmem:[%s5071_s3 + $0x38] sm:$0xff]  ;;  %v458_v18 = vld [vmem:[%s5071_s3 + $0xc0] sm:$0xff]  ;;  %v459_v19 = vld [vmem:[%s5071_s3 + $0xc8] sm:$0xff] }
  0x53   :  { %4579 = vmatprep.subr.bf16.mxu0 %v4578_v30  ;;  %v4552_v20 = vpack.c.bf16 %v441_v17, %v440_v16  ;;  %v4554_v21 = vpack.c.bf16 %v459_v19, %v458_v18  ;;  %v442_v22 = vld [vmem:[%s5071_s3 + $0x40] sm:$0xff]  ;;  %v443_v23 = vld [vmem:[%s5071_s3 + $0x48] sm:$0xff]  ;;  %v460_v24 = vld [vmem:[%s5071_s3 + $0xd0] sm:$0xff] }
  0x54   :  { %v461_v25 = vld [vmem:[%s5071_s3 + $0xd8] sm:$0xff]  ;;  %v4556_v26 = vpack.c.bf16 %v443_v23, %v442_v22  ;;  %v444_v28 = vld [vmem:[%s5071_s3 + $0x50] sm:$0xff]  ;;  %v462_v30 = vld [vmem:[%s5071_s3 + $0xe0] sm:$0xff] }
  0x55   :  { %v4558_v27 = vpack.c.bf16 %v461_v25, %v460_v24  ;;  %v445_v29 = vld [vmem:[%s5071_s3 + $0x58] sm:$0xff]  ;;  %v463_v31 = vld [vmem:[%s5071_s3 + $0xe8] sm:$0xff]  ;;  %v446_v34 = vld [vmem:[%s5071_s3 + $0x60] sm:$0xff] }
  0x56   :  { %4581 = vmatpush3.bf16.msra.mxu0 %v4580_v33  ;;  %v4560_v32 = vpack.c.bf16 %v445_v29, %v444_v28  ;;  %v4562_v33 = vpack.c.bf16 %v463_v31, %v462_v30  ;;  %v447_v35 = vld [vmem:[%s5071_s3 + $0x68] sm:$0xff]  ;;  %v477_v38 = vld [vmem:[%s5071_s3 + $0x158] sm:$0xff]  ;;  %v464_v40 = vld [vmem:[%s5071_s3 + $0xf0] sm:$0xff] }
  0x57   :  { %4583 = vmatprep.subr.bf16.mxu0 %v4582_v36  ;;  %v476_v36 = vld [vmem:[%s5071_s3 + $0x150] sm:$0xff]  ;;  %v4564_v37 = vpack.c.bf16 %v447_v35, %v446_v34  ;;  %v465_v41 = vld [vmem:[%s5071_s3 + $0xf8] sm:$0xff]  ;;  %v495_v44 = vld [vmem:[%s5071_s3 + $0x1e8] sm:$0xff] }
  0x58   :  { %v4566_v43 = vpack.c.bf16 %v465_v41, %v464_v40  ;;  %v449_v46 = vld [vmem:[%s5071_s3 + $0x78] sm:$0xff]  ;;  %v478_v49 = vld [vmem:[%s5071_s3 + $0x160] sm:$0xff]  ;;  %v479_v50 = vld [vmem:[%s5071_s3 + $0x168] sm:$0xff] }
  0x59   :  { %v497_v53 = vld [vmem:[%s5071_s3 + $0x1f8] sm:$0xff]  ;;  %v646_v7 = vld [vmem:[%s5136_s21] sm:$0xff]  ;;  %v647_v13 = vld [vmem:[%s5136_s21 + $0x8] sm:$0xff] }
  0x5a   :  { %4585 = vmatpush3.bf16.msra.mxu0 %v4584_v39  ;;  %v4592_v39 = vpack.c.bf16 %v477_v38, %v476_v36  ;;  %v481_v56 = vld [vmem:[%s5071_s3 + $0x178] sm:$0xff]  ;;  %v4603_v18 = vpack.c.bf16 %v647_v13, %v646_v7  ;;  %v648_v23 = vld [vmem:[%s5136_s21 + $0x10] sm:$0xff]  ;;  %v650_v29 = vld [vmem:[%s5136_s21 + $0x20] sm:$0xff] }
  0x5b   :  { %4587 = vmatprep.subr.bf16.mxu0 %v4586_v42  ;;  %v494_v42 = vld [vmem:[%s5071_s3 + $0x1e0] sm:$0xff]  ;;  %v649_v24 = vld [vmem:[%s5136_s21 + $0x18] sm:$0xff]  ;;  %v651_v30 = vld [vmem:[%s5136_s21 + $0x28] sm:$0xff] }
  0x5c   :  { %v4594_v47 = vpack.c.bf16 %v495_v44, %v494_v42  ;;  %v4606_v28 = vpack.c.bf16 %v649_v24, %v648_v23  ;;  %v652_v31 = vld [vmem:[%s5136_s21 + $0x30] sm:$0xff]  ;;  %v654_v34 = vld [vmem:[%s5136_s21 + $0x40] sm:$0xff]  ;;  %v655_v35 = vld [vmem:[%s5136_s21 + $0x48] sm:$0xff] }
  0x5d   :  { %v656_v36 = vld [vmem:[%s5136_s21 + $0x50] sm:$0xff]  ;;  %v659_v40 = vld [vmem:[%s5136_s21 + $0x68] sm:$0xff]  ;;  %v920_v13 = vld [vmem:[%s5116_s27] sm:$0xff] }
  0x5e   :  { %4589 = vmatpush3.bf16.msra.mxu0 %v4588_v45  ;;  %v448_v45 = vld [vmem:[%s5071_s3 + $0x70] sm:$0xff]  ;;  %v912_v7 = vld [vmem:[%s5101_s6 + $0x8] sm:$0xff]  ;;  %v923_v23 = vld [vmem:[%s5116_s27 + $0x18] sm:$0xff] }
  0x5f   :  { %4591 = vmatprep.subr.bf16.mxu0 %v4590_v48  ;;  %v4568_v48 = vpack.c.bf16 %v449_v46, %v448_v45  ;;  %v660_v42 = vld [vmem:[%s5136_s21 + $0x70] sm:$0xff]  ;;  %v903_v45 = vld [vmem:[%s5086_s19] sm:$0xff]  ;;  %v904_v46 = vld [vmem:[%s5086_s19 + $0x8] sm:$0xff] }
  0x62   :  { %4593 = vmatpush3.bf16.msra.mxu0 %v4592_v39  ;;  %v658_v39 = vld [vmem:[%s5136_s21 + $0x60] sm:$0xff] }
  0x63   :  { %4595 = vmatprep.subr.bf16.mxu0 %v4594_v47  ;;  %v4621_v41 = vpack.c.bf16 %v659_v40, %v658_v39  ;;  %v5347_v47 = vpack.c.bf16 %v904_v46, %v903_v45  ;;  %v918_v45 = vld [vmem:[%s5826_s0 + $0x10] sm:$0xff]  ;;  %v919_v46 = vld [vmem:[%s5826_s0 + $0x18] sm:$0xff] }
 0x120   :  { %v254_v55 = vpop.f32.mrb[0].mxu0 }
 0x121   :  { %v4177_v58 = vpop.f32.mrb[1].mxu0  ;;  %3773 = vmatmul.mubr.msk.f32.vlgmr.msra.gmra.mrb[0].mxu1 %vm284_vm3, %v254_v55 }
 0x122   :  { %360 = vmatpush1.msra.mxu1 %v260_v51  ;;  %423 = vmatprep.mubr.f32.mxu1 %v5019_v8  ;;  %v4596_v51 = vpack.c.bf16 %v479_v50, %v478_v49  ;;  %v266_v58 = vsub.s32 0, %v5206_v9  ;;  %v906_v49 = vld [vmem:[%s5086_s19 + $0x18] sm:$0xff] }
 0x123   :  { %4539 = vmatprep.subr.bf16.mxu1 %v4538_v52  ;;  %v496_v52 = vld [vmem:[%s5071_s3 + $0x1f0] sm:$0xff] }
 0x124   :  { %4597 = vmatpush3.bf16.msra.mxu0 %v4596_v51  ;;  %v4598_v54 = vpack.c.bf16 %v497_v53, %v496_v52 }
 0x125   :  { %3774 = vmatmul.mubr.msk.f32.vlgmr.msra.gmra.mrb[2].mxu1 %vm284_vm3, %v254_v55  ;;  %v480_v55 = vld [vmem:[%s5071_s3 + $0x170] sm:$0xff]  ;;  %s5832_s3 = sld [smem:[#allocation19_spill]] }
 0x126   :  { %4541 = vmatpush3.bf16.msra.mxu1 %v4540_v59  ;;  %v4600_v57 = vpack.c.bf16 %v481_v56, %v480_v55  ;;  %4599 = vmatprep.subr.bf16.mxu0 %v4598_v54  ;;  %v262_v59 = vld [vmem:[%s5066_s29] sm:$0xf]  ;;  %s5831_s29 = sld [smem:[#allocation17_spill]] }
 0x127   :  { %4543 = vmatprep.subr.bf16.mxu1 %v4542_v60  ;;  %v270_v60 = vsub.s32 1, %v5206_v9  ;;  %v267_v61 = vrot.slane %v262_v59, %v266_v58  ;;  %v275_v6 = vrot.slane %v262_v59, %v274_v62  ;;  %v3775_v54 = vld [vmem:[%s5076_s8] ss:$0 sm:$0xff]  ;;  %s5833_s8 = sld [smem:[#allocation11_spill]] }
 0x128   :  { %4601 = vmatpush3.bf16.msra.mxu0 %v4600_v57 }
 0x129   :  { %4626 = vmatprep.subr.bf16.mxu0 %v5017_v4  ;;  %v271_v63 = vrot.slane %v262_v59, %v270_v60 }
 0x12a   :  { %4545 = vmatpush3.bf16.msra.mxu1 %v4544_v1 }
 0x12b   :  { %4547 = vmatprep.subr.bf16.mxu1 %v4546_v2 }
 0x12e   :  { %4549 = vmatpush3.bf16.msra.mxu1 %v4548_v14 }
 0x12f   :  { %4551 = vmatprep.subr.bf16.mxu1 %v4550_v15  ;;  %v279_v15 = vrot.slane %v262_v59, %v278_v0 }
 0x132   :  { %4553 = vmatpush3.bf16.msra.mxu1 %v4552_v20 }
 0x133   :  { %4555 = vmatprep.subr.bf16.mxu1 %v4554_v21 }
 0x136   :  { %4557 = vmatpush3.bf16.msra.mxu1 %v4556_v26  ;;  %v155_v26 = vadd.s32 7, %v151_v12  ;;  %v4609_v12 = vpack.c.bf16 %v651_v30, %v650_v29  ;;  %v910_v29 = vld [vmem:[%s5096_s30 + $0x18] sm:$0xff] }
 0x137   :  { %4559 = vmatprep.subr.bf16.mxu1 %v4558_v27 }
 0x138   :  { %vm156_vm4 = vcmp.eq.s32.totalorder %v5208_v10, %v155_v26  ;;  %v908_v26 = vld [vmem:[%s5096_s30 + $0x8] sm:$0xff] }
 0x13a   :  { %4561 = vmatpush3.bf16.msra.mxu1 %v4560_v32  ;;  %v653_v32 = vld [vmem:[%s5136_s21 + $0x38] sm:$0xff] }
 0x13b   :  { %4563 = vmatprep.subr.bf16.mxu1 %v4562_v33  ;;  %v4612_v33 = vpack.c.bf16 %v653_v32, %v652_v31 }
 0x13e   :  { %4565 = vmatpush3.bf16.msra.mxu1 %v4564_v37  ;;  %v657_v37 = vld [vmem:[%s5136_s21 + $0x58] sm:$0xff] }
 0x13f   :  { %4567 = vmatprep.subr.bf16.mxu1 %v4566_v43  ;;  %v4618_v38 = vpack.c.bf16 %v657_v37, %v656_v36  ;;  %v661_v43 = vld [vmem:[%s5136_s21 + $0x78] sm:$0xff]  ;;  %s5829_s21 = sld [smem:[#allocation16_spill]] }
 0x140   :  { %v4624_v44 = vpack.c.bf16 %v661_v43, %v660_v42  ;;  %v916_v42 = vld [vmem:[%s5826_s0] sm:$0xff]  ;;  %v917_v43 = vld [vmem:[%s5826_s0 + $0x8] sm:$0xff] }
 0x142   :  { %4569 = vmatpush3.bf16.msra.mxu1 %v4568_v48  ;;  %v905_v48 = vld [vmem:[%s5086_s19 + $0x10] sm:$0xff]  ;;  %s5020_s19 = smov 127  }
 0x143   :  { %4602 = vmatprep.subr.bf16.mxu1 %v5017_v4  ;;  %v5354_v50 = vpack.c.bf16 %v906_v49, %v905_v48  ;;  %v5442_v48 = vpack.c.bf16 %v919_v46, %v918_v45 }
 0x1f4   :  { %v354_v1 = vpop.f32.mrb[0].mxu1 }
 0x1f5   :  { %v355_v2 = vadd.f32 %v354_v1, %v267_v61  ;;  %v356_v3 = vpop.f32.mrb[1].mxu1  ;;  %v822_v1 = vld [vmem:[%s5081_s14] sm:$0xff]  ;;  %s5834_s14 = sld [smem:[#allocation12_spill]] }
 0x1f6   :  { %v357_v14 = vadd.f32 %v356_v3, %v271_v63 }
 0x1f7   :  { %v430_v19 = vmax.f32 %v355_v2, 0.0 }
 0x1f8   :  { %v431_v16 = vmax.f32 %v357_v14, 0.0  ;;  %v425_v17 = vpop.f32.mrb[2].mxu1 }
 0x1f9   :  { %v426_v20 = vadd.f32 %v425_v17, %v275_v6  ;;  %v427_v21 = vpop.f32.mrb[3].mxu1  ;;  %v911_v6 = vld [vmem:[%s5101_s6] sm:$0xff] }
 0x1fa   :  { %v428_v22 = vadd.f32 %v427_v21, %v279_v15  ;;  %569 = vmatprep.mubr.f32.mxu1 %v431_v16  ;;  %v5372_v14 = vpack.c.bf16 %v912_v7, %v911_v6  ;;  %v921_v15 = vld [vmem:[%s5116_s27 + $0x8] sm:$0xff]  ;;  %v922_v21 = vld [vmem:[%s5116_s27 + $0x10] sm:$0xff]  ;;  %s5024_s27 = smov 126  }
 0x1fb   :  { %570 = vmatmul.mubr.f32.vlgmr.msra.gmra.mrb[4].mxu1 %v430_v19  ;;  %v432_v27 = vmax.f32 %v426_v20, 0.0  ;;  %v5375_v16 = vpack.c.bf16 %v921_v15, %v920_v13  ;;  %v913_v19 = vld [vmem:[%s5101_s6 + $0x10] sm:$0xff]  ;;  %v914_v20 = vld [vmem:[%s5101_s6 + $0x18] sm:$0xff]  ;;  %v5387_v24 = vpack.c.bf16 %v923_v23, %v922_v21  ;;  %s5835_s6 = sld [smem:[#allocation10_spill]] }
 0x1fc   :  { %v433_v25 = vmax.f32 %v428_v22, 0.0  ;;  %4604 = vmatpush3.bf16.msra.mxu1 %v4603_v18  ;;  %4210 = vmatprep.mubr.msk.f32.mxu1 %vm5018_vm0, %v5019_v8  ;;  %v5384_v22 = vpack.c.bf16 %v914_v20, %v913_v19 }
 0x1fd   :  { %4605 = vmatprep.subr.bf16.mxu1 %v5017_v4 }
 0x1fe   :  { %639 = vmatprep.mubr.f32.mxu0 %v433_v25  ;;  %v907_v25 = vld [vmem:[%s5096_s30] sm:$0xff] }
 0x1ff   :  { %640 = vmatmul.mubr.f32.vlgmr.msra.gmra.mrb[2].mxu0 %v432_v27  ;;  %v5394_v27 = vpack.c.bf16 %v908_v26, %v907_v25 }
 0x200   :  { %4628 = vmatpush3.bf16.msra.mxu0 %v5200_v5  ;;  %4221 = vmatprep.mubr.msk.f32.mxu0 %vm5018_vm0, %v5019_v8  ;;  %v3767_v5 = vsel %vm156_vm4, 1.0, %v5019_v8 }
 0x201   :  { %4629 = vmatprep.subr.bf16.mxu0 %v5017_v4  ;;  %4607 = vmatpush3.bf16.msra.mxu1 %v4606_v28  ;;  %v909_v28 = vld [vmem:[%s5096_s30 + $0x10] sm:$0xff]  ;;  %s5023_s30 = smov 121  }
 0x202   :  { %4608 = vmatprep.subr.bf16.mxu1 %v5017_v4  ;;  %v5402_v30 = vpack.c.bf16 %v910_v29, %v909_v28 }
 0x204   :  { %4631 = vmatpush3.bf16.msra.mxu0 %v5211_v11  ;;  %v4615_v11 = vpack.c.bf16 %v655_v35, %v654_v34 }
 0x205   :  { %4610 = vmatpush3.bf16.msra.mxu1 %v4609_v12  ;;  %4632 = vmatprep.subr.bf16.mxu0 %v5017_v4  ;;  %v3776_v12 = vld [vmem:[%s5141_s17] ss:$0 sm:$0xff]  ;;  %s5828_s17 = sld [smem:[#allocation15_spill]] }
 0x206   :  { %4611 = vmatprep.subr.bf16.mxu1 %v5017_v4 }
 0x207   :  { %4222 = vmatmul.mubr.msk.f32.vlgmr.msra.gmra.mrb[4].mxu0 %vm184_vm2, %v3767_v5 }
 0x208   :  { %4237 = vmatprep.mubr.msk.f32.mxu0 %vm5018_vm0, %v5019_v8  ;;  %4634 = vmatpush3.bf16.msra.mxu0 %v5347_v47 }
 0x209   :  { %4613 = vmatpush3.bf16.msra.mxu1 %v4612_v33  ;;  %4635 = vmatprep.subr.bf16.mxu0 %v5017_v4  ;;  %v3778_v33 = vld [vmem:[%s5091_s24] ss:$0 sm:$0xff]  ;;  %s5021_s24 = smov 125  }
 0x20a   :  { %4614 = vmatprep.subr.bf16.mxu1 %v5017_v4 }
 0x20c   :  { %4637 = vmatpush3.bf16.msra.mxu0 %v5354_v50 }
 0x20d   :  { %4616 = vmatpush3.bf16.msra.mxu1 %v4615_v11  ;;  %4638 = vmatprep.subr.bf16.mxu0 %v5017_v4 }
 0x20e   :  { %4617 = vmatprep.subr.bf16.mxu1 %v5017_v4 }
 0x20f   :  { %4238 = vmatmul.mubr.f32.vlgmr.msra.gmra.mrb[6].mxu0 %v5019_v8 }
 0x210   :  { %4248 = vmatprep.mubr.msk.f32.mxu0 %vm5018_vm0, %v5019_v8  ;;  %4640 = vmatpush3.bf16.msra.mxu0 %v5372_v14 }
 0x211   :  { %4619 = vmatpush3.bf16.msra.mxu1 %v4618_v38  ;;  %4641 = vmatprep.subr.bf16.mxu0 %v5017_v4 }
 0x212   :  { %4620 = vmatprep.subr.bf16.mxu1 %v5017_v4 }
 0x214   :  { %4643 = vmatpush3.bf16.msra.mxu0 %v5384_v22 }
 0x215   :  { %4622 = vmatpush3.bf16.msra.mxu1 %v4621_v41  ;;  %4644 = vmatprep.subr.bf16.mxu0 %v5017_v4 }
 0x216   :  { %4623 = vmatprep.subr.bf16.mxu1 %v5017_v4 }
 0x217   :  { %4249 = vmatmul.mubr.f32.vlgmr.msra.gmra.mrb[8].mxu0 %v5019_v8 }
 0x218   :  { %4646 = vmatpush3.bf16.msra.mxu0 %v5394_v27  ;;  %4259 = vmatprep.mubr.msk.f32.mxu0 %vm5018_vm0, %v5019_v8 }
 0x219   :  { %4625 = vmatpush3.bf16.msra.mxu1 %v4624_v44  ;;  %4647 = vmatprep.subr.bf16.mxu0 %v5017_v4  ;;  %v5436_v44 = vpack.c.bf16 %v917_v43, %v916_v42 }
 0x21a   :  { %4224 = vmatprep.subr.mxu1 %v5019_v8 }
 0x21c   :  { %4649 = vmatpush3.bf16.msra.mxu0 %v5402_v30 }
 0x21d   :  { %4656 = vmatprep.subr.bf16.mxu0 %v5017_v4 }
 0x2ce   :  { %v3873_v51 = vpop.f32.mrb[4].mxu1 }
 0x2cf   :  { %v3874_v52 = vpop.f32.mrb[5].mxu1 }
 0x2d0   :  { %v3875_v53 = vadd.f32 %v3874_v52, %v3873_v51 }
 0x2d2   :  { %v3908_v55 = vpop.f32.mrb[2].mxu0  ;;  %v572_v57 = vadd.f32 %v3875_v53, %v3775_v54 }
 0x2d3   :  { %v3909_v56 = vpop.f32.mrb[3].mxu0 }
 0x2d4   :  { %v3910_v59 = vadd.f32 %v3909_v56, %v3908_v55 }
 0x2d6   :  { %v642_v61 = vadd.f32 %v3910_v59, %v572_v57 }
 0x2d8   :  { %v645_v63 = vmax.f32 %v642_v61, 0.0 }
 0x2da   :  { %4211 = vmatmul.mubr.f32.vlgmr.msra.gmra.mrb[6].mxu1 %v645_v63  ;;  %v818_v2 = vpop.f32.mrb[4].mxu0 }
 0x2db   :  { %v4223_v3 = vpop.f32.mrb[5].mxu0  ;;  %4225 = vmatpush3.msra.mxu1 %v822_v1  ;;  %4226 = vmatprep.mubr.msk.f32.mxu1 %vm5018_vm0, %v5019_v8 }
 0x2dc   :  { %4650 = vmatprep.subr.bf16.mxu1 %v5017_v4 }
 0x2de   :  { %4227 = vmatmul.mubr.msk.f32.vlgmr.msra.gmra.mrb[8].mxu1 %vm284_vm3, %v818_v2  ;;  %v5473_v2 = vld [vmem:[%s5828_s17] sm:$0x1] }
 0x2df   :  { %4270 = vmatprep.mubr.msk.f32.mxu1 %vm5018_vm0, %v5019_v8  ;;  %4652 = vmatpush3.bf16.msra.mxu1 %v5375_v16 }
 0x2e0   :  { %4653 = vmatprep.subr.bf16.mxu1 %v5017_v4 }
 0x2e2   :  { %v994_v17 = vpop.f32.mrb[6].mxu0 }
 0x2e3   :  { %v4239_v18 = vpop.f32.mrb[7].mxu0  ;;  %4655 = vmatpush3.bf16.msra.mxu1 %v5387_v24 }
 0x2e4   :  { %4662 = vmatprep.subr.bf16.mxu1 %v5017_v4 }
 0x2e6   :  { %4271 = vmatmul.mubr.f32.vlgmr.msra.gmra.mrb[10].mxu1 %v5019_v8 }
 0x2e7   :  { %4664 = vmatpush3.bf16.msra.mxu1 %v5347_v47  ;;  %4292 = vmatprep.mubr.msk.f32.mxu1 %vm5018_vm0, %v5019_v8 }
 0x2e8   :  { %4665 = vmatprep.subr.bf16.mxu1 %v5017_v4 }
 0x2ea   :  { %v1066_v38 = vpop.f32.mrb[8].mxu0 }
 0x2eb   :  { %4667 = vmatpush3.bf16.msra.mxu1 %v5354_v50  ;;  %v4250_v39 = vpop.f32.mrb[9].mxu0 }
 0x2ec   :  { %4674 = vmatprep.subr.bf16.mxu1 %v5017_v4 }
 0x3ad   :  { %v735_v31 = vpop.f32.mrb[6].mxu1 }
 0x3ae   :  { %v5416_v32 = vadd.f32 %v3776_v12, %v735_v31  ;;  %v4212_v5 = vpop.f32.mrb[7].mxu1 }
 0x3b0   :  { %3696 = vst.msk [vmem:[%s5184_s9] sm:$0xf] %vm3695_vm5, %v5416_v32  ;;  %s5827_s9 = sld [smem:[#allocation13_spill]] }
 0x3b1   :  { %v899_v34 = vpop.f32.mrb[8].mxu1 }
 0x3b2   :  { %v5421_v35 = vadd.f32 %v3778_v33, %v899_v34  ;;  %v4228_v11 = vpop.f32.mrb[9].mxu1 }
 0x3b4   :  { %v998_v36 = vadd.f32 %v994_v17, %v5421_v35 }
 0x3b6   :  { %4906 = vtanh.f32 %v998_v36  ;;  %v5447_v49 = vld [vmem:[%s5827_s9] sm:$0x1] }
 0x3b9   :  { %v1211_v40 = vpop.f32.mrb[10].mxu1 }
 0x3ba   :  { %v4272_v41 = vpop.f32.mrb[11].mxu1 }
 0x3c0   :  { %v4907_v37 = vpop.eup %4906 }
 0x3c1   :  { %4260 = vmatmul.mubr.msk.f32.vlgmr.msra.gmra.mrb[10].mxu0 %vm184_vm2, %v4907_v37  ;;  %4293 = vmatmul.mubr.msk.f32.vlgmr.msra.gmra.mrb[12].mxu1 %vm184_vm2, %v4907_v37 }
 0x3c2   :  { %4676 = vmatpush3.bf16.msra.mxu1 %v5394_v27  ;;  %4281 = vmatprep.mubr.msk.f32.mxu0 %vm5018_vm0, %v5019_v8 }
 0x3c3   :  { %4677 = vmatprep.subr.bf16.mxu1 %v5017_v4  ;;  %4314 = vmatprep.mubr.msk.f32.mxu1 %vm5018_vm0, %v5019_v8 }
 0x3c4   :  { %4658 = vmatpush3.bf16.msra.mxu0 %v5436_v44 }
 0x3c5   :  { %4659 = vmatprep.subr.bf16.mxu0 %v5017_v4 }
 0x3c6   :  { %4679 = vmatpush3.bf16.msra.mxu1 %v5402_v30 }
 0x3c7   :  { %4686 = vmatprep.subr.bf16.mxu1 %v5017_v4 }
 0x3c8   :  { %4661 = vmatpush3.bf16.msra.mxu0 %v5442_v48 }
 0x3c9   :  { %4668 = vmatprep.subr.bf16.mxu0 %v5017_v4 }
 0x494   :  { %v1139_v51 = vpop.f32.mrb[10].mxu0  ;;  %v1358_v52 = vpop.f32.mrb[12].mxu1 }
 0x495   :  { %v1140_v53 = vadd.f32 %v1139_v51, %v1066_v38  ;;  %v1363_v54 = vrot.slane %v1358_v52, 7  ;;  %v4261_v55 = vpop.f32.mrb[11].mxu0  ;;  %v4294_v56 = vpop.f32.mrb[13].mxu1 }
 0x497   :  { %v1143_v57 = vadd.f32 %v1140_v53, %v5447_v49  ;;  %v1365_v59 = vadd.f32 %v1363_v54, %v5421_v35 }
 0x499   :  { %4908 = vtanh.f32 %v1143_v57 }
 0x49a   :  { %4910 = vtanh.f32 %v1365_v59 }
 0x4a3   :  { %v4909_v61 = vpop.eup %4908 }
 0x4a4   :  { %v4911_v63 = vpop.eup %4910  ;;  %4282 = vmatmul.mubr.msk.f32.vlgmr.msra.gmra.mrb[12].mxu0 %vm184_vm2, %v4909_v61 }
 0x4a5   :  { %v1438_v1 = vrot.slane %v4911_v63, 1  ;;  %4670 = vmatpush3.bf16.msra.mxu0 %v5372_v14  ;;  %4303 = vmatprep.mubr.msk.f32.mxu0 %vm5018_vm0, %v5019_v8 }
 0x4a6   :  { %4671 = vmatprep.subr.bf16.mxu0 %v5017_v4 }
 0x4a7   :  { %4315 = vmatmul.mubr.msk.f32.vlgmr.msra.gmra.mrb[14].mxu1 %vm184_vm2, %v1438_v1 }
 0x4a8   :  { %4688 = vmatpush3.bf16.msra.mxu1 %v5436_v44  ;;  %4336 = vmatprep.mubr.msk.f32.mxu1 %vm5018_vm0, %v5019_v8 }
 0x4a9   :  { %4673 = vmatpush3.bf16.msra.mxu0 %v5384_v22  ;;  %4689 = vmatprep.subr.bf16.mxu1 %v5017_v4 }
 0x4aa   :  { %4680 = vmatprep.subr.bf16.mxu0 %v5017_v4 }
 0x4ac   :  { %4304 = vmatmul.mubr.msk.f32.vlgmr.msra.gmra.mrb[14].mxu0 %vm184_vm2, %v4909_v61  ;;  %4691 = vmatpush3.bf16.msra.mxu1 %v5442_v48 }
 0x4ad   :  { %4682 = vmatpush3.bf16.msra.mxu0 %v5375_v16  ;;  %4325 = vmatprep.mubr.msk.f32.mxu0 %vm5018_vm0, %v5019_v8 }
 0x4ae   :  { %4683 = vmatprep.subr.bf16.mxu0 %v5017_v4  ;;  %4698 = vmatprep.subr.bf16.mxu1 %v5017_v4 }
 0x4b1   :  { %4685 = vmatpush3.bf16.msra.mxu0 %v5387_v24 }
 0x4b2   :  { %4692 = vmatprep.subr.bf16.mxu0 %v5017_v4 }
 0x577   :  { %v1284_v3 = vpop.f32.mrb[12].mxu0 }
 0x578   :  { %v1285_v6 = vadd.f32 %v1284_v3, %v1211_v40  ;;  %v4283_v7 = vpop.f32.mrb[13].mxu0 }
 0x579   :  { %v2406_v7 = vld [vmem:[%s5829_s21 + $0x18] sm:$0xff] }
 0x57a   :  { %v1288_v13 = vadd.f32 %v1285_v6, %v5473_v2  ;;  %v1507_v15 = vpop.f32.mrb[14].mxu1  ;;  %v2405_v6 = vld [vmem:[%s5829_s21 + $0x10] sm:$0xff] }
 0x57b   :  { %v4316_v17 = vpop.f32.mrb[15].mxu1 }
 0x57c   :  { %4912 = vtanh.f32 %v1288_v13  ;;  %v4756_v13 = vpack.c.bf16 %v2406_v7, %v2405_v6  ;;  %v2488_v17 = vld [vmem:[%s5830_s25 + $0x8] sm:$0xff] }
 0x57f   :  { %v1433_v18 = vpop.f32.mrb[14].mxu0 }
 0x580   :  { %v1508_v19 = vadd.f32 %v1507_v15, %v1433_v18  ;;  %v4305_v20 = vpop.f32.mrb[15].mxu0  ;;  %v2487_v15 = vld [vmem:[%s5830_s25] sm:$0xff]  ;;  %v2489_v18 = vld [vmem:[%s5830_s25 + $0x10] sm:$0xff] }
 0x581   :  { %v2490_v20 = vld [vmem:[%s5830_s25 + $0x18] sm:$0xff] }
 0x582   :  { %v1511_v21 = vadd.f32 %v1508_v19, %v5447_v49  ;;  %v4759_v19 = vpack.c.bf16 %v2488_v17, %v2487_v15 }
 0x584   :  { %4914 = vtanh.f32 %v1511_v21  ;;  %v4762_v21 = vpack.c.bf16 %v2490_v20, %v2489_v18 }
 0x586   :  { %v4913_v23 = vpop.eup %4912 }
 0x587   :  { %1291 = vst.msk [vmem:[#allocation2] sm:$0x1] %vm1290_vm6, %v4913_v23  ;;  %4326 = vmatmul.mubr.msk.f32.vlgmr.msra.gmra.mrb[16].mxu0 %vm184_vm2, %v4913_v23  ;;  %v2491_v23 = vld [vmem:[%s5830_s25 + $0x20] sm:$0xff] }
 0x588   :  { %4694 = vmatpush3.bf16.msra.mxu0 %v5347_v47  ;;  %4347 = vmatprep.mubr.msk.f32.mxu0 %vm5018_vm0, %v5019_v8 }
 0x589   :  { %4695 = vmatprep.subr.bf16.mxu0 %v5017_v4 }
 0x58c   :  { %4697 = vmatpush3.bf16.msra.mxu0 %v5354_v50 }
 0x58d   :  { %4704 = vmatprep.subr.bf16.mxu0 %v5017_v4 }
 0x58e   :  { %v4915_v25 = vpop.eup %4914 }
 0x58f   :  { %4337 = vmatmul.mubr.msk.f32.vlgmr.msra.gmra.mrb[16].mxu1 %vm184_vm2, %v4915_v25  ;;  %4348 = vmatmul.mubr.msk.f32.vlgmr.msra.gmra.mrb[18].mxu0 %vm184_vm2, %v1438_v1  ;;  %v2404_v1 = vld [vmem:[%s5829_s21 + $0x8] sm:$0xff] }
 0x590   :  { %4700 = vmatpush3.bf16.msra.mxu1 %v5372_v14  ;;  %4358 = vmatprep.mubr.msk.f32.mxu1 %vm5018_vm0, %v5019_v8 }
 0x591   :  { %4701 = vmatprep.subr.bf16.mxu1 %v5017_v4  ;;  %4706 = vmatpush3.bf16.msra.mxu0 %v5394_v27 }
 0x592   :  { %4707 = vmatprep.subr.bf16.mxu0 %v5017_v4  ;;  %4369 = vmatprep.mubr.msk.f32.mxu0 %vm5018_vm0, %v5019_v8 }
 0x594   :  { %4703 = vmatpush3.bf16.msra.mxu1 %v5384_v22 }
 0x595   :  { %4710 = vmatprep.subr.bf16.mxu1 %v5017_v4  ;;  %4709 = vmatpush3.bf16.msra.mxu0 %v5402_v30 }
 0x596   :  { %4716 = vmatprep.subr.bf16.mxu0 %v5017_v4 }
 0x597   :  { %4359 = vmatmul.mubr.msk.f32.vlgmr.msra.gmra.mrb[18].mxu1 %vm184_vm2, %v4915_v25  ;;  %v2492_v25 = vld [vmem:[%s5830_s25 + $0x28] sm:$0xff] }
 0x598   :  { %4712 = vmatpush3.bf16.msra.mxu1 %v5375_v16  ;;  %4380 = vmatprep.mubr.msk.f32.mxu1 %vm5018_vm0, %v5019_v8 }
 0x599   :  { %4713 = vmatprep.subr.bf16.mxu1 %v5017_v4 }
 0x59c   :  { %4715 = vmatpush3.bf16.msra.mxu1 %v5387_v24 }
 0x59d   :  { %4722 = vmatprep.subr.bf16.mxu1 %v5017_v4 }
 0x65a   :  { %v1582_v26 = vpop.f32.mrb[16].mxu0 }
 0x65b   :  { %v4327_v28 = vpop.f32.mrb[17].mxu0 }
 0x65c   :  { %v2493_v28 = vld [vmem:[%s5830_s25 + $0x30] sm:$0xff] }
 0x662   :  { %v1655_v29 = vpop.f32.mrb[16].mxu1  ;;  %v1728_v12 = vpop.f32.mrb[18].mxu0 }
 0x663   :  { %v1656_v31 = vadd.f32 %v1655_v29, %v1582_v26  ;;  %v1733_v5 = vrot.slane %v1728_v12, 6  ;;  %v4338_v33 = vpop.f32.mrb[17].mxu1  ;;  %v4349_v34 = vpop.f32.mrb[19].mxu0  ;;  %v4765_v26 = vpack.c.bf16 %v2492_v25, %v2491_v23  ;;  %v2494_v29 = vld [vmem:[%s5830_s25 + $0x38] sm:$0xff] }
 0x664   :  { %v4768_v12 = vpack.c.bf16 %v2494_v29, %v2493_v28  ;;  %v2497_v34 = vld [vmem:[%s5830_s25 + $0x50] sm:$0xff]  ;;  %v3604_v28 = vmul.f32 1.442695, %v5416_v32  ;;  %v2815_v29 = vadd.s32 1, %v5206_v9 }
 0x665   :  { %v1659_v11 = vadd.f32 %v1656_v31, %v5473_v2  ;;  %v1735_v36 = vadd.f32 %v1733_v5, %v5421_v35  ;;  %v2495_v31 = vld [vmem:[%s5830_s25 + $0x40] sm:$0xff]  ;;  %v2496_v5 = vld [vmem:[%s5830_s25 + $0x48] sm:$0xff] }
 0x666   :  { %v4771_v33 = vpack.c.bf16 %v2496_v5, %v2495_v31  ;;  %v739_v5 = vld [vmem:[%s5835_s6] sm:$0xf] }
 0x667   :  { %4916 = vtanh.f32 %v1659_v11  ;;  %v2498_v11 = vld [vmem:[%s5830_s25 + $0x58] sm:$0xff] }
 0x668   :  { %4918 = vtanh.f32 %v1735_v36  ;;  %v4774_v36 = vpack.c.bf16 %v2498_v11, %v2497_v34  ;;  %v3597_v34 = vadd.f32 1.0, %v5416_v32 }
 0x66a   :  { %v1803_v37 = vpop.f32.mrb[18].mxu1 }
 0x66b   :  { %v4360_v38 = vpop.f32.mrb[19].mxu1 }
 0x66c   :  { %v2500_v38 = vld [vmem:[%s5830_s25 + $0x68] sm:$0xff] }
 0x671   :  { %v4917_v39 = vpop.eup %4916 }
 0x672   :  { %v4919_v40 = vpop.eup %4918  ;;  %1661 = vst.msk [vmem:[#allocation2 + $0x1] sm:$0x1] %vm1290_vm6, %v4917_v39  ;;  %4381 = vmatmul.mubr.msk.f32.vlgmr.msra.gmra.mrb[20].mxu1 %vm184_vm2, %v4917_v39 }
 0x673   :  { %v1808_v41 = vrot.slane %v4919_v40, 2  ;;  %4724 = vmatpush3.bf16.msra.mxu1 %v5347_v47  ;;  %4402 = vmatprep.mubr.msk.f32.mxu1 %vm5018_vm0, %v5019_v8 }
 0x674   :  { %4725 = vmatprep.subr.bf16.mxu1 %v5017_v4 }
 0x675   :  { %4370 = vmatmul.mubr.msk.f32.vlgmr.msra.gmra.mrb[20].mxu0 %vm184_vm2, %v1808_v41 }
 0x676   :  { %4718 = vmatpush3.bf16.msra.mxu0 %v5436_v44  ;;  %4391 = vmatprep.mubr.msk.f32.mxu0 %vm5018_vm0, %v5019_v8 }
 0x677   :  { %4727 = vmatpush3.bf16.msra.mxu1 %v5354_v50  ;;  %4719 = vmatprep.subr.bf16.mxu0 %v5017_v4 }
 0x678   :  { %4734 = vmatprep.subr.bf16.mxu1 %v5017_v4 }
 0x67a   :  { %4403 = vmatmul.mubr.msk.f32.vlgmr.msra.gmra.mrb[22].mxu1 %vm184_vm2, %v1808_v41  ;;  %4721 = vmatpush3.bf16.msra.mxu0 %v5442_v48 }
 0x67b   :  { %4728 = vmatprep.subr.bf16.mxu0 %v5017_v4  ;;  %4736 = vmatpush3.bf16.msra.mxu1 %v5394_v27 }
 0x67c   :  { %4737 = vmatprep.subr.bf16.mxu1 %v5017_v4  ;;  %4424 = vmatprep.mubr.msk.f32.mxu1 %vm5018_vm0, %v5019_v8 }
 0x67f   :  { %4739 = vmatpush3.bf16.msra.mxu1 %v5402_v30 }
 0x680   :  { %4746 = vmatprep.subr.bf16.mxu1 %v5017_v4 }
 0x745   :  { %v1952_v47 = vpop.f32.mrb[20].mxu1 }
 0x746   :  { %v4382_v50 = vpop.f32.mrb[21].mxu1 }
 0x748   :  { %v1877_v42 = vpop.f32.mrb[20].mxu0 }
 0x749   :  { %v1878_v43 = vadd.f32 %v1877_v42, %v1803_v37  ;;  %v4371_v45 = vpop.f32.mrb[21].mxu0  ;;  %v2499_v37 = vld [vmem:[%s5830_s25 + $0x60] sm:$0xff] }
 0x74a   :  { %v4777_v39 = vpack.c.bf16 %v2500_v38, %v2499_v37 }
 0x74b   :  { %v1881_v46 = vadd.f32 %v1878_v43, %v5447_v49 }
 0x74d   :  { %4920 = vtanh.f32 %v1881_v46  ;;  %v2098_v51 = vpop.f32.mrb[22].mxu1 }
 0x74e   :  { %v2103_v52 = vrot.slane %v2098_v51, 5  ;;  %v4404_v27 = vpop.f32.mrb[23].mxu1  ;;  %v2501_v51 = vld [vmem:[%s5830_s25 + $0x70] sm:$0xff] }
 0x74f   :  { %v3797_v27 = vld [vmem:[%s5831_s29] ss:$0 sm:$0xff] }
 0x750   :  { %v2105_v53 = vadd.f32 %v2103_v52, %v5421_v35  ;;  %v2502_v52 = vld [vmem:[%s5830_s25 + $0x78] sm:$0xff] }
 0x752   :  { %4922 = vtanh.f32 %v2105_v53 }
 0x757   :  { %v4921_v54 = vpop.eup %4920 }
 0x758   :  { %4392 = vmatmul.mubr.msk.f32.vlgmr.msra.gmra.mrb[22].mxu0 %vm184_vm2, %v4921_v54 }
 0x759   :  { %4730 = vmatpush3.bf16.msra.mxu0 %v5372_v14  ;;  %4413 = vmatprep.mubr.msk.f32.mxu0 %vm5018_vm0, %v5019_v8 }
 0x75a   :  { %4731 = vmatprep.subr.bf16.mxu0 %v5017_v4 }
 0x75c   :  { %v4923_v30 = vpop.eup %4922 }
 0x75d   :  { %v2178_v55 = vrot.slane %v4923_v30, 3  ;;  %4733 = vmatpush3.bf16.msra.mxu0 %v5384_v22 }
 0x75e   :  { %4740 = vmatprep.subr.bf16.mxu0 %v5017_v4 }
 0x75f   :  { %4425 = vmatmul.mubr.msk.f32.vlgmr.msra.gmra.mrb[24].mxu1 %vm184_vm2, %v2178_v55 }
 0x760   :  { %4414 = vmatmul.mubr.msk.f32.vlgmr.msra.gmra.mrb[24].mxu0 %vm184_vm2, %v4921_v54  ;;  %4748 = vmatpush3.bf16.msra.mxu1 %v5436_v44 }
 0x761   :  { %4742 = vmatpush3.bf16.msra.mxu0 %v5375_v16  ;;  %4435 = vmatprep.mubr.msk.f32.mxu0 %vm5018_vm0, %v5019_v8 }
 0x762   :  { %4743 = vmatprep.subr.bf16.mxu0 %v5017_v4  ;;  %4749 = vmatprep.subr.bf16.mxu1 %v5017_v4 }
 0x763   :  { %4446 = vmatprep.mubr.msk.f32.mxu1 %vm5018_vm0, %v5019_v8 }
 0x764   :  { %4751 = vmatpush3.bf16.msra.mxu1 %v5442_v48 }
 0x765   :  { %4745 = vmatpush3.bf16.msra.mxu0 %v5387_v24  ;;  %4758 = vmatprep.subr.bf16.mxu1 %v5017_v4 }
 0x766   :  { %4752 = vmatprep.subr.bf16.mxu0 %v5017_v4 }
 0x82b   :  { %v2025_v14 = vpop.f32.mrb[22].mxu0 }
 0x82c   :  { %v2026_v16 = vadd.f32 %v2025_v14, %v1952_v47  ;;  %v4393_v22 = vpop.f32.mrb[23].mxu0 }
 0x82e   :  { %v2029_v35 = vadd.f32 %v2026_v16, %v5473_v2 }
 0x830   :  { %4924 = vtanh.f32 %v2029_v35 }
 0x832   :  { %v2247_v44 = vpop.f32.mrb[24].mxu1 }
 0x833   :  { %v2173_v56 = vpop.f32.mrb[24].mxu0  ;;  %v4426_v57 = vpop.f32.mrb[25].mxu1 }
 0x834   :  { %v2248_v48 = vadd.f32 %v2247_v44, %v2173_v56  ;;  %v4415_v59 = vpop.f32.mrb[25].mxu0  ;;  %v740_v56 = vmul.f32 0.5, %v5416_v32 }
 0x835   :  { %v159_v59 = vadd.s32 8, %v5206_v9 }
 0x836   :  { %v2251_v24 = vadd.f32 %v2248_v48, %v5447_v49  ;;  %v2403_v49 = vld [vmem:[%s5829_s21] sm:$0xff]  ;;  %v741_v57 = vmul.f32 1.442695, %v740_v56  ;;  %v162_v48 = vmul.u32 8, %v5208_v10  ;;  %s3835_s21 = sld [smem:[#allocation3 + $0x3]] }
 0x837   :  { %v4753_v3 = vpack.c.bf16 %v2404_v1, %v2403_v49  ;;  %v161_v1 = vadd.s32 24, %v5206_v9 }
 0x838   :  { %4926 = vtanh.f32 %v2251_v24  ;;  %v160_v24 = vadd.s32 16, %v5206_v9  ;;  %vm163_vm8 = vcmp.ge.s32.totalorder %v5206_v9, %v162_v48  ;;  %v167_v49 = vadd.s32 8, %v162_v48 }
 0x839   :  { %vm164_vm10 = vcmp.ge.s32.totalorder %v159_v59, %v162_v48  ;;  %vm166_vm4 = vcmp.ge.s32.totalorder %v161_v1, %v162_v48 }
 0x83a   :  { %v4925_v61 = vpop.eup %4924  ;;  %vm168_vm11 = vcmp.lt.s32.totalorder %v5206_v9, %v167_v49  ;;  %vm169_vm12 = vcmp.lt.s32.totalorder %v159_v59, %v167_v49  ;;  %vm165_vm13 = vcmp.ge.s32.totalorder %v160_v24, %v162_v48  ;;  %vm170_vm14 = vcmp.lt.s32.totalorder %v160_v24, %v167_v49 }
 0x83b   :  { %2031 = vst.msk [vmem:[#allocation2 + $0x2] sm:$0x1] %vm1290_vm6, %v4925_v61  ;;  %4436 = vmatmul.mubr.msk.f32.vlgmr.msra.gmra.mrb[26].mxu0 %vm184_vm2, %v4925_v61  ;;  %v2580_v61 = vld [vmem:[%s5833_s8] sm:$0xf]  ;;  %vm172_vm15 = vmand %vm163_vm8, %vm168_vm11  ;;  %vm171_vm5 = vcmp.lt.s32.totalorder %v161_v1, %v167_v49  ;;  %vm2816_vm8 = vcmp.eq.s32.totalorder %v5208_v10, %v2815_v29  ;;  %vm2819_vm11 = vcmask 56320  }
 0x83c   :  { %4457 = vmatprep.mubr.msk.f32.mxu0 %vm5018_vm0, %v5019_v8  ;;  %4754 = vmatpush3.bf16.msra.mxu0 %v4753_v3  ;;  %v3768_v15 = vsel %vm172_vm15, 1.0, %v5019_v8  ;;  %v3811_v31 = vsel %vm2816_vm8, 1.0, %v5019_v8  ;;  %v3319_v29 = vld [vmem:[%s5838_s11] sm:$0xff] }
 0x83d   :  { %4755 = vmatprep.subr.bf16.mxu0 %v5017_v4 }
 0x840   :  { %4757 = vmatpush3.bf16.msra.mxu0 %v4756_v13 }
 0x842   :  { %v4927_v63 = vpop.eup %4926 }
 0x843   :  { %4447 = vmatmul.mubr.msk.f32.vlgmr.msra.gmra.mrb[26].mxu1 %vm184_vm2, %v4927_v63  ;;  %v2590_v63 = vld [vmem:[%s5834_s14] sm:$0xf] }
 0x844   :  { %4492 = vmatprep.mubr.msk.f32.mxu1 %vm5018_vm0, %v5019_v8  ;;  %4760 = vmatpush3.bf16.msra.mxu1 %v4759_v19 }
 0x845   :  { %4761 = vmatprep.subr.bf16.mxu1 %v5017_v4 }
 0x848   :  { %4763 = vmatpush3.bf16.msra.mxu1 %v4762_v21 }
 0x849   :  { %4764 = vmatprep.subr.bf16.mxu1 %v5017_v4 }
 0x84c   :  { %4766 = vmatpush3.bf16.msra.mxu1 %v4765_v26  ;;  %v3598_v26 = vmul.f32 %v5416_v32, %v5416_v32 }
 0x84d   :  { %4767 = vmatprep.subr.bf16.mxu1 %v5017_v4 }
 0x850   :  { %4769 = vmatpush3.bf16.msra.mxu1 %v4768_v12 }
 0x851   :  { %4770 = vmatprep.subr.bf16.mxu1 %v5017_v4 }
 0x854   :  { %4772 = vmatpush3.bf16.msra.mxu1 %v4771_v33 }
 0x855   :  { %4773 = vmatprep.subr.bf16.mxu1 %v5017_v4 }
 0x858   :  { %4775 = vmatpush3.bf16.msra.mxu1 %v4774_v36 }
 0x859   :  { %4776 = vmatprep.subr.bf16.mxu1 %v5017_v4 }
 0x85c   :  { %4778 = vmatpush3.bf16.msra.mxu1 %v4777_v39 }
 0x85d   :  { %4779 = vmatprep.subr.bf16.mxu1 %v5017_v4  ;;  %v4780_v4 = vpack.c.bf16 %v2502_v52, %v2501_v51 }
 0x860   :  { %4781 = vmatpush3.bf16.msra.mxu1 %v4780_v4 }
 0x90e   :  { %v2322_v40 = vpop.f32.mrb[26].mxu0 }
 0x90f   :  { %v4437_v41 = vpop.f32.mrb[27].mxu0 }
 0x916   :  { %v2395_v47 = vpop.f32.mrb[26].mxu1 }
 0x917   :  { %v2396_v50 = vadd.f32 %v2395_v47, %v2322_v40  ;;  %v4448_v42 = vpop.f32.mrb[27].mxu1 }
 0x919   :  { %v2399_v43 = vadd.f32 %v2396_v50, %v5473_v2  ;;  %v3799_v2 = vld [vmem:[%s5832_s3] ss:$0 sm:$0xff] }
 0x91b   :  { %4928 = vtanh.f32 %v2399_v43 }
 0x925   :  { %v4929_v45 = vpop.eup %4928 }
 0x926   :  { %2401 = vst.msk [vmem:[#allocation2 + $0x3] sm:$0x1] %vm1290_vm6, %v4929_v45  ;;  %vm174_vm6 = vmand %vm165_vm13, %vm170_vm14  ;;  %vm2998_vm13 = vcmask 1040384   ;;  %vm2985_vm14 = vcmask 7168  }
 0x927   :  { %v5620_v19 = vsel %vm174_vm6, 1.0, %v5019_v8 }
 0x92d   :  { %v2402_v46 = vld [vmem:[#allocation2] sm:$0xf] }
 0x92e   :  { %4458 = vmatmul.mubr.msk.f32.vlgmr.msra.gmra.mrb[28].mxu0 %vm184_vm2, %v2402_v46  ;;  %vm173_vm2 = vmand %vm164_vm10, %vm169_vm12  ;;  %vm2823_vm10 = vcmask 1046528   ;;  %vm3611_vm12 = vcmask 52224  }
 0x92f   :  { %4497 = vmatprep.mubr.msk.f32.mxu0 %vm2600_vm9, %v3768_v15  ;;  %v5616_v18 = vsel %vm173_vm2, 1.0, %v5019_v8 }
 0xa01   :  { %v2483_v53 = vpop.f32.mrb[28].mxu0 }
 0xa02   :  { %v2484_v54 = vadd.f32 %v3797_v27, %v2483_v53  ;;  %v4459_v30 = vpop.f32.mrb[29].mxu0  ;;  %v2801_v53 = vld [vmem:[%s5836_s10 + $0x8] sm:$0xff] }
 0xa04   :  { %4493 = vmatmul.mubr.f32.vlgmr.msra.gmra.mrb[28].mxu1 %v2484_v54  ;;  %v2800_v54 = vld [vmem:[%s5836_s10] sm:$0xff] }
 0xa05   :  { %3189 = vmatprep.mubr.f32.mxu1 %v5019_v8 }
 0xad7   :  { %v2576_v55 = vpop.f32.mrb[28].mxu1 }
 0xad8   :  { %v5596_v14 = vadd.f32 %v3799_v2, %v2576_v55  ;;  %v4494_v16 = vpop.f32.mrb[29].mxu1 }
 0xada   :  { %3698 = vst.msk [vmem:[%s5189_s13] sm:$0xf] %vm3697_vm7, %v5596_v14  ;;  %v2581_v22 = vmul.f32 0.5, %v5596_v14  ;;  %s5022_s13 = smov 2   ;;  %vm175_vm7 = vmand %vm166_vm4, %vm171_vm5  ;;  %v3627_v46 = vmul.f32 1.442695, %v5596_v14 }
 0xadb   :  { %v5629_v21 = vsel %vm175_vm7, 1.0, %v5019_v8 }
 0xadc   :  { %v2582_v35 = vmul.f32 1.442695, %v2581_v22 }
 0xade   :  { %4930 = vpow2.f32 %v2582_v35 }
 0xadf   :  { %4932 = vpow2.f32 %v741_v57  ;;  %v2802_v57 = vld [vmem:[%s5836_s10 + $0x10] sm:$0xff] }
 0xae0   :  { %4934 = vpow2.f32 %v3604_v28 }
 0xae1   :  { %4936 = vpow2.f32 %v3627_v46  ;;  %v3339_v46 = vld [vmem:[%s5838_s11 + $0xa0] sm:$0xff] }
 0xae8   :  { %v4931_v44 = vpop.eup %4930 }
 0xae9   :  { %2585 = vrot.lane.b32.xlu1 %v4931_v44, %s5020_s19  ;;  %2591 = vrot.lane.b32.xlu0 %v4931_v44, %s5021_s24  ;;  %v4933_v20 = vpop.eup %4932  ;;  %v2803_v44 = vld [vmem:[%s5836_s10 + $0x18] sm:$0xff] }
 0xaea   :  { %v4935_v38 = vpop.eup %4934 }
 0xaeb   :  { %v4937_v51 = vpop.eup %4936 }
 0xb5b   :  { %v2586_v3 = vpop.permute.xlu1 %2585  ;;  %v2592_v6 = vpop.permute.xlu0 %2591 }
 0xb5c   :  { %v2588_v7 = vmul.f32 %v2586_v3, %v2580_v61  ;;  %v2594_v13 = vmul.f32 %v2592_v6, %v2590_v63 }
 0xb5e   :  { %v2589_v17 = vadd.f32 %v2588_v7, %v5596_v14  ;;  %2596 = vrot.lane.b32.xlu0 %v2594_v13, %s5022_s13 }
 0xb60   :  { %4495 = vmatprep.subr.msk.mxu0 %vm2613_vm1, %v2589_v17 }
 0xb61   :  { %4496 = vmatpush3.msk.msra.mxu0 %vm2613_vm1, %v2589_v17  ;;  %v3090_v17 = vld [vmem:[%s5837_s7 + $0x18] sm:$0xff] }
 0xb62   :  { %744 = vrot.lane.b32.xlu0 %v4933_v20, %s5023_s30  ;;  %4498 = vmatmul.mubr.msk.f32.vlgmr.msra.gmra.mrb[30].mxu0 %vm2600_vm9, %v5616_v18  ;;  %v3335_v20 = vld [vmem:[%s5838_s11 + $0x80] sm:$0xff] }
 0xb63   :  { %4500 = vmatprep.mubr.msk.f32.mxu0 %vm2600_vm9, %v5620_v19 }
 0xb66   :  { %4501 = vmatmul.mubr.msk.f32.gmra.mrb[32].mxu0 %vm2600_vm9, %v5629_v21 }
 0xb67   :  { %4505 = vmatprep.mubr.msk.f32.mxu0 %vm2600_vm9, %v3768_v15 }
 0xbd0   :  { %v2597_v23 = vpop.permute.xlu0 %2596 }
 0xbd1   :  { %v2599_v25 = vadd.f32 %v2597_v23, %v5596_v14  ;;  %v3367_v23 = vld [vmem:[%s5838_s11 + $0x180] sm:$0xff] }
 0xbd3   :  { %2703 = vrot.lane.b32.xlu1 %v2599_v25, %s5024_s27 }
 0xbd4   :  { %v745_v33 = vpop.permute.xlu0 %744 }
 0xbd5   :  { %v747_v36 = vmul.f32 %v745_v33, %v739_v5  ;;  %v3352_v5 = vld [vmem:[%s5838_s11 + $0x108] sm:$0xff]  ;;  %v3337_v33 = vld [vmem:[%s5838_s11 + $0x90] sm:$0xff] }
 0xbd7   :  { %3600 = vrot.lane.b32.xlu1 %v3598_v26, %s5025_s4  ;;  %v748_v40 = vadd.f32 %v747_v36, %v5416_v32  ;;  %v3368_v26 = vld [vmem:[%s5838_s11 + $0x188] sm:$0xff]  ;;  %v3370_v36 = vld [vmem:[%s5838_s11 + $0x198] sm:$0xff] }
 0xbd8   :  { %v4814_v28 = vpack.c.bf16 %v3368_v26, %v3367_v23  ;;  %v3360_v26 = vld [vmem:[%s5838_s11 + $0x148] sm:$0xff] }
 0xc35   :  { %v4499_v41 = vpop.f32.mrb[30].mxu0 }
 0xc36   :  { %v2683_v47 = vpop.f32.mrb[31].mxu0  ;;  %v2794_v32 = vmul.f32 1.442695, %v4499_v41  ;;  %v3322_v41 = vld [vmem:[%s5838_s11 + $0x18] sm:$0xff] }
 0xc37   :  { %v2792_v52 = vmul.f32 1.442695, %v2683_v47 }
 0xc38   :  { %4938 = vpow2.f32 %v2794_v32  ;;  %v3371_v32 = vld [vmem:[%s5838_s11 + $0x1a0] sm:$0xff] }
 0xc39   :  { %v4502_v50 = vpop.f32.mrb[32].mxu0  ;;  %4940 = vpow2.f32 %v2792_v52  ;;  %v3372_v52 = vld [vmem:[%s5838_s11 + $0x1a8] sm:$0xff] }
 0xc3a   :  { %v2693_v42 = vpop.f32.mrb[33].mxu0  ;;  %v2798_v4 = vmul.f32 1.442695, %v4502_v50 }
 0xc3b   :  { %v2796_v27 = vmul.f32 1.442695, %v2693_v42 }
 0xc3c   :  { %4942 = vpow2.f32 %v2798_v4 }
 0xc3d   :  { %4944 = vpow2.f32 %v2796_v27 }
 0xc42   :  { %v4939_v30 = vpop.eup %4938 }
 0xc43   :  { %v4941_v55 = vpop.eup %4940 }
 0xc45   :  { %v2704_v12 = vpop.permute.xlu1 %2703 }
 0xc46   :  { %4503 = vmatprep.subr.msk.mxu0 %vm2613_vm1, %v2704_v12  ;;  %v4943_v48 = vpop.eup %4942 }
 0xc47   :  { %4504 = vmatpush3.msk.msra.mxu0 %vm2613_vm1, %v2704_v12  ;;  %v4945_v61 = vpop.eup %4944  ;;  %v3320_v12 = vld [vmem:[%s5838_s11 + $0x8] sm:$0xff] }
 0xc48   :  { %4506 = vmatmul.mubr.msk.f32.vlgmr.msra.gmra.mrb[34].mxu0 %vm2600_vm9, %v5616_v18  ;;  %4511 = vmatprep.subr.mxu0 %v5019_v8 }
 0xc49   :  { %v3601_v11 = vpop.permute.xlu1 %3600  ;;  %4508 = vmatprep.mubr.msk.f32.mxu0 %vm2600_vm9, %v5620_v19  ;;  %4512 = vmatpush3.msk.msra.mxu0 %vm2823_vm10, %v3811_v31  ;;  %v3351_v31 = vld [vmem:[%s5838_s11 + $0x100] sm:$0xff] }
 0xc4a   :  { %v3603_v37 = vsub.f32 %v3597_v34, %v3601_v11  ;;  %v3338_v34 = vld [vmem:[%s5838_s11 + $0x98] sm:$0xff]  ;;  %v3369_v11 = vld [vmem:[%s5838_s11 + $0x190] sm:$0xff] }
 0xc4b   :  { %v4786_v50 = vpack.c.bf16 %v3338_v34, %v3337_v33  ;;  %v4818_v42 = vpack.c.bf16 %v3370_v36, %v3369_v11  ;;  %v3329_v33 = vld [vmem:[%s5838_s11 + $0x50] sm:$0xff]  ;;  %v3330_v34 = vld [vmem:[%s5838_s11 + $0x58] sm:$0xff] }
 0xc4c   :  { %v3606_v39 = vsub.f32 %v3603_v37, %v4935_v38  ;;  %4509 = vmatmul.mubr.msk.f32.gmra.mrb[36].mxu0 %vm2600_vm9, %v5629_v21  ;;  %v4784_v38 = vpack.c.bf16 %v3320_v12, %v3319_v29  ;;  %v3377_v29 = vld [vmem:[%s5838_s11 + $0x1d0] sm:$0xff]  ;;  %v3378_v12 = vld [vmem:[%s5838_s11 + $0x1d8] sm:$0xff] }
 0xc4d   :  { %4513 = vmatprep.mubr.msk.f32.mxu0 %vm5018_vm0, %v5019_v8  ;;  %vm2812_vm0 = vcmp.eq.s32.totalorder %v5208_v10, 0  ;;  %v3088_v10 = vld [vmem:[%s5837_s7 + $0x8] sm:$0xff]  ;;  %v4834_v36 = vpack.c.bf16 %v3378_v12, %v3377_v29 }
 0xc4e   :  { %3608 = vrot.lane.b32.xlu0 %v3606_v39, %s5023_s30  ;;  %v3810_v13 = vsel %vm2812_vm0, 1.0, %v5019_v8  ;;  %3125 = vmatprep.subr.mxu1 %v3088_v10  ;;  %v4816_v39 = vpack.c.bf16 %v3352_v5, %v3351_v31  ;;  %v3376_v10 = vld [vmem:[%s5838_s11 + $0x1c8] sm:$0xff] }
 0xc50   :  { %4514 = vmatmul.mubr.msk.f32.vlgmr.msra.gmra.mrb[38].mxu0 %vm2819_vm11, %v748_v40  ;;  %v3321_v40 = vld [vmem:[%s5838_s11 + $0x10] sm:$0xff] }
 0xc51   :  { %4518 = vmatprep.mubr.msk.f32.mxu0 %vm2600_vm9, %v3768_v15  ;;  %v4788_v27 = vpack.c.bf16 %v3322_v41, %v3321_v40  ;;  %v3348_v40 = vld [vmem:[%s5838_s11 + $0xe8] sm:$0xff]  ;;  %v3379_v41 = vld [vmem:[%s5838_s11 + $0x1e0] sm:$0xff] }
 0xcc0   :  { %v3609_v43 = vpop.permute.xlu0 %3608 }
 0xcc1   :  { %v3612_v45 = vsel %vm3611_vm12, %v3609_v43, 0.0  ;;  %v3353_v43 = vld [vmem:[%s5838_s11 + $0x110] sm:$0xff] }
 0xcc2   :  { %3613 = vadd.xlane.f32.xlu0 %v3612_v45  ;;  %v3354_v45 = vld [vmem:[%s5838_s11 + $0x118] sm:$0xff] }
 0xcd8   :  { %3630 = vrot.lane.b32.xlu0 %v4937_v51, %s5020_s19  ;;  %v3340_v51 = vld [vmem:[%s5838_s11 + $0xa8] sm:$0xff] }
 0xd1b   :  { %v4507_v2 = vpop.f32.mrb[34].mxu0 }
 0xd1c   :  { %v2805_v16 = vsub.f32 %v2801_v53, %v4507_v2  ;;  %v2773_v22 = vpop.f32.mrb[35].mxu0  ;;  %v4820_v53 = vpack.c.bf16 %v3354_v45, %v3353_v43 }
 0xd1d   :  { %v2804_v35 = vsub.f32 %v2800_v54, %v2773_v22  ;;  %v3323_v54 = vld [vmem:[%s5838_s11 + $0x20] sm:$0xff] }
 0xd1e   :  { %v2809_v56 = vmul.f32 %v4939_v30, %v2805_v16  ;;  %v3324_v30 = vld [vmem:[%s5838_s11 + $0x28] sm:$0xff]  ;;  %v4822_v16 = vpack.c.bf16 %v3372_v52, %v3371_v32  ;;  %v3355_v22 = vld [vmem:[%s5838_s11 + $0x120] sm:$0xff] }
 0xd1f   :  { %v2808_v59 = vmul.f32 %v4941_v55, %v2804_v35  ;;  %v4510_v24 = vpop.f32.mrb[36].mxu0  ;;  %v4790_v55 = vpack.c.bf16 %v3340_v51, %v3339_v46  ;;  %v3356_v35 = vld [vmem:[%s5838_s11 + $0x128] sm:$0xff]  ;;  %v3331_v46 = vld [vmem:[%s5838_s11 + $0x60] sm:$0xff] }
 0xd20   :  { %v2807_v63 = vsub.f32 %v2803_v44, %v4510_v24  ;;  %v2783_v49 = vpop.f32.mrb[37].mxu0  ;;  %v3341_v44 = vld [vmem:[%s5838_s11 + $0xb0] sm:$0xff]  ;;  %v4824_v24 = vpack.c.bf16 %v3356_v35, %v3355_v22  ;;  %v3332_v51 = vld [vmem:[%s5838_s11 + $0x68] sm:$0xff]  ;;  %v3363_v32 = vld [vmem:[%s5838_s11 + $0x160] sm:$0xff] }
 0xd21   :  { %v2806_v1 = vsub.f32 %v2802_v57, %v2783_v49  ;;  %v3373_v57 = vld [vmem:[%s5838_s11 + $0x1b0] sm:$0xff]  ;;  %v4808_v52 = vpack.c.bf16 %v3332_v51, %v3331_v46  ;;  %v3334_v22 = vld [vmem:[%s5838_s11 + $0x78] sm:$0xff] }
 0xd22   :  { %v2811_v3 = vmul.f32 %v4943_v48, %v2807_v63  ;;  %v3374_v48 = vld [vmem:[%s5838_s11 + $0x1b8] sm:$0xff] }
 0xd23   :  { %v2810_v6 = vmul.f32 %v4945_v61, %v2806_v1  ;;  %v2893_v7 = vpop.f32.mrb[38].mxu0  ;;  %v3325_v61 = vld [vmem:[%s5838_s11 + $0x30] sm:$0xff]  ;;  %v3326_v63 = vld [vmem:[%s5838_s11 + $0x38] sm:$0xff]  ;;  %v4826_v1 = vpack.c.bf16 %v3374_v48, %v3373_v57 }
 0xd24   :  { %v4515_v15 = vpop.f32.mrb[39].mxu0  ;;  %4516 = vmatprep.subr.msk.mxu0 %vm2613_vm1, %v2893_v7  ;;  %v3366_v57 = vld [vmem:[%s5838_s11 + $0x178] sm:$0xff] }
 0xd25   :  { %4517 = vmatpush3.msk.msra.mxu0 %vm2613_vm1, %v2893_v7  ;;  %v3343_v7 = vld [vmem:[%s5838_s11 + $0xc0] sm:$0xff] }
 0xd26   :  { %4519 = vmatmul.mubr.msk.f32.vlgmr.msra.gmra.mrb[40].mxu0 %vm2600_vm9, %v5616_v18  ;;  %4524 = vmatprep.subr.msk.mxu0 %vm2998_vm13, %v3810_v13  ;;  %v3087_v18 = vld [vmem:[%s5837_s7] sm:$0xff] }
 0xd27   :  { %4521 = vmatprep.mubr.msk.f32.mxu0 %vm2600_vm9, %v5620_v19  ;;  %4525 = vmatpush3.msk.msra.mxu0 %vm2998_vm13, %v3810_v13  ;;  %v3089_v19 = vld [vmem:[%s5837_s7 + $0x10] sm:$0xff]  ;;  %v3344_v13 = vld [vmem:[%s5838_s11 + $0xc8] sm:$0xff]  ;;  %v3375_v15 = vld [vmem:[%s5838_s11 + $0x1c0] sm:$0xff] }
 0xd28   :  { %3214 = vmatprep.subr.mxu0 %v3090_v17  ;;  %3126 = vmatpush1.msra.mxu1 %v3087_v18  ;;  %v4796_v17 = vpack.c.bf16 %v3326_v63, %v3325_v61  ;;  %v4830_v23 = vpack.c.bf16 %v3376_v10, %v3375_v15 }
 0xd2a   :  { %4522 = vmatmul.mubr.msk.f32.gmra.mrb[42].mxu0 %vm2600_vm9, %v5629_v21  ;;  %v3336_v21 = vld [vmem:[%s5838_s11 + $0x88] sm:$0xff] }
 0xd2b   :  { %4526 = vmatprep.mubr.msk.f32.mxu0 %vm2985_vm14, %v2808_v59  ;;  %v4782_v25 = vpack.c.bf16 %v3336_v21, %v3335_v20  ;;  %v4792_v59 = vpack.c.bf16 %v3324_v30, %v3323_v54  ;;  %v3328_v20 = vld [vmem:[%s5838_s11 + $0x48] sm:$0xff]  ;;  %v4798_v21 = vpack.c.bf16 %v3344_v13, %v3343_v7  ;;  %v3350_v54 = vld [vmem:[%s5838_s11 + $0xf8] sm:$0xff]  ;;  %v3381_v30 = vld [vmem:[%s5838_s11 + $0x1f0] sm:$0xff] }
 0xd2d   :  { %4783 = vmatprep.subr.bf16.mxu1 %v4782_v25  ;;  %v3359_v25 = vld [vmem:[%s5838_s11 + $0x140] sm:$0xff] }
 0xd2e   :  { %4527 = vmatmul.mubr.msk.f32.vlgmr.msra.gmra.mrb[40].mxu0 %vm2985_vm14, %v2809_v56  ;;  %v3342_v56 = vld [vmem:[%s5838_s11 + $0xb8] sm:$0xff]  ;;  %v4832_v5 = vpack.c.bf16 %v3360_v26, %v3359_v25 }
 0xd2f   :  { %4529 = vmatprep.mubr.msk.f32.mxu0 %vm2985_vm14, %v2810_v6  ;;  %3215 = vmatpush1.msra.mxu0 %v3089_v19  ;;  %v4794_v49 = vpack.c.bf16 %v3342_v56, %v3341_v44  ;;  %v3358_v6 = vld [vmem:[%s5838_s11 + $0x138] sm:$0xff]  ;;  %v3327_v19 = vld [vmem:[%s5838_s11 + $0x40] sm:$0xff]  ;;  %v3365_v56 = vld [vmem:[%s5838_s11 + $0x170] sm:$0xff] }
 0xd30   :  { %4815 = vmatprep.subr.bf16.mxu0 %v4814_v28  ;;  %v3345_v28 = vld [vmem:[%s5838_s11 + $0xd0] sm:$0xff]  ;;  %v4800_v31 = vpack.c.bf16 %v3328_v20, %v3327_v19  ;;  %v4844_v48 = vpack.c.bf16 %v3366_v57, %v3365_v56  ;;  %v3564_v56 = vstv %s3560_s18 }
 0xd32   :  { %4530 = vmatmul.mubr.msk.f32.gmra.mrb[42].mxu0 %vm2985_vm14, %v2811_v3  ;;  %v3357_v3 = vld [vmem:[%s5838_s11 + $0x130] sm:$0xff] }
 0xd33   :  { %3278 = vmatprep.mubr.f32.mxu0 %v5019_v8  ;;  %v4828_v18 = vpack.c.bf16 %v3358_v6, %v3357_v3 }
 0xe01   :  { %v4528_v37 = vpop.f32.mrb[40].mxu0 }
 0xe02   :  { %v3068_v47 = vpop.f32.mrb[41].mxu0 }
 0xe03   :  { %3824 = vmatmul.mubr.msk.f32.vlgmr.msra.gmra.mrb[30].mxu1 %vm284_vm3, %v3068_v47  ;;  %3828 = vmatmul.mubr.msk.f32.vlgmr.msra.gmra.mrb[44].mxu0 %vm284_vm3, %v3068_v47  ;;  %v3380_v47 = vld [vmem:[%s5838_s11 + $0x1e8] sm:$0xff] }
 0xe04   :  { %3195 = vmatprep.mubr.f32.mxu1 %v5019_v8  ;;  %3284 = vmatprep.mubr.f32.mxu0 %v5019_v8  ;;  %v4838_v45 = vpack.c.bf16 %v3380_v47, %v3379_v41 }
 0xe05   :  { %v4531_v4 = vpop.f32.mrb[42].mxu0  ;;  %4785 = vmatpush3.bf16.msra.mxu1 %v4784_v38  ;;  %4817 = vmatpush3.bf16.msra.mxu0 %v4816_v39  ;;  %v3362_v38 = vld [vmem:[%s5838_s11 + $0x158] sm:$0xff]  ;;  %v3347_v39 = vld [vmem:[%s5838_s11 + $0xe0] sm:$0xff] }
 0xe06   :  { %v3078_v2 = vpop.f32.mrb[43].mxu0  ;;  %4787 = vmatprep.subr.bf16.mxu1 %v4786_v50  ;;  %4819 = vmatprep.subr.bf16.mxu0 %v4818_v42  ;;  %v4804_v50 = vpack.c.bf16 %v3330_v34, %v3329_v33  ;;  %v4806_v43 = vpack.c.bf16 %v3348_v40, %v3347_v39 }
 0xe07   :  { %3825 = vmatmul.mubr.msk.f32.gmra.mrb[32].mxu1 %vm284_vm3, %v4528_v37  ;;  %3829 = vmatmul.mubr.msk.f32.gmra.mrb[46].mxu0 %vm284_vm3, %v4528_v37  ;;  %v3361_v37 = vld [vmem:[%s5838_s11 + $0x150] sm:$0xff] }
 0xe08   :  { %3201 = vmatprep.mubr.f32.mxu1 %v5019_v8  ;;  %3290 = vmatprep.mubr.f32.mxu0 %v5019_v8  ;;  %v4836_v42 = vpack.c.bf16 %v3362_v38, %v3361_v37 }
 0xe09   :  { %4789 = vmatpush3.bf16.msra.mxu1 %v4788_v27  ;;  %4821 = vmatpush3.bf16.msra.mxu0 %v4820_v53  ;;  %v3349_v53 = vld [vmem:[%s5838_s11 + $0xf0] sm:$0xff] }
 0xe0a   :  { %4791 = vmatprep.subr.bf16.mxu1 %v4790_v55  ;;  %4823 = vmatprep.subr.bf16.mxu0 %v4822_v16  ;;  %v3382_v55 = vld [vmem:[%s5838_s11 + $0x1f8] sm:$0xff]  ;;  %v3333_v16 = vld [vmem:[%s5838_s11 + $0x70] sm:$0xff] }
 0xe0b   :  { %3826 = vmatmul.mubr.msk.f32.gmra.mrb[34].mxu1 %vm284_vm3, %v3078_v2  ;;  %3830 = vmatmul.mubr.msk.f32.gmra.mrb[48].mxu0 %vm284_vm3, %v3078_v2  ;;  %v4810_v2 = vpack.c.bf16 %v3350_v54, %v3349_v53  ;;  %v4842_v35 = vpack.c.bf16 %v3382_v55, %v3381_v30  ;;  %v4812_v44 = vpack.c.bf16 %v3334_v22, %v3333_v16  ;;  %v3832_v55 = vld [vmem:[%s5840_s15] ss:$0 sm:$0xff] }
 0xe0c   :  { %3207 = vmatprep.mubr.f32.mxu1 %v5019_v8  ;;  %3296 = vmatprep.mubr.f32.mxu0 %v5019_v8  ;;  %v3346_v8 = vld [vmem:[%s5838_s11 + $0xd8] sm:$0xff] }
 0xe0d   :  { %4793 = vmatpush3.bf16.msra.mxu1 %v4792_v59  ;;  %4825 = vmatpush3.bf16.msra.mxu0 %v4824_v24  ;;  %v4802_v11 = vpack.c.bf16 %v3346_v8, %v3345_v28  ;;  %v3091_v59 = vld [vmem:[%s5839_s16] sm:$0xf] }
 0xe0e   :  { %4795 = vmatprep.subr.bf16.mxu1 %v4794_v49  ;;  %4827 = vmatprep.subr.bf16.mxu0 %v4826_v1  ;;  %v3096_v24 = vrot.slane %v3091_v59, %v266_v58  ;;  %v3104_v61 = vrot.slane %v3091_v59, %v274_v62  ;;  %v3100_v63 = vrot.slane %v3091_v59, %v270_v60 }
 0xe0f   :  { %3827 = vmatmul.mubr.msk.f32.gmra.mrb[36].mxu1 %vm284_vm3, %v4531_v4  ;;  %3831 = vmatmul.mubr.msk.f32.gmra.mrb[50].mxu0 %vm284_vm3, %v4531_v4  ;;  %v3364_v4 = vld [vmem:[%s5838_s11 + $0x168] sm:$0xff]  ;;  %v3108_v49 = vrot.slane %v3091_v59, %v278_v0 }
 0xe10   :  { %v4840_v27 = vpack.c.bf16 %v3364_v4, %v3363_v32 }
 0xe11   :  { %4797 = vmatpush3.bf16.msra.mxu1 %v4796_v17  ;;  %4829 = vmatpush3.bf16.msra.mxu0 %v4828_v18 }
 0xe12   :  { %4799 = vmatprep.subr.bf16.mxu1 %v4798_v21  ;;  %4831 = vmatprep.subr.bf16.mxu0 %v4830_v23 }
 0xe15   :  { %4801 = vmatpush3.bf16.msra.mxu1 %v4800_v31  ;;  %4833 = vmatpush3.bf16.msra.mxu0 %v4832_v5 }
 0xe16   :  { %4803 = vmatprep.subr.bf16.mxu1 %v4802_v11  ;;  %4835 = vmatprep.subr.bf16.mxu0 %v4834_v36 }
 0xe19   :  { %4805 = vmatpush3.bf16.msra.mxu1 %v4804_v50  ;;  %4837 = vmatpush3.bf16.msra.mxu0 %v4836_v42 }
 0xe1a   :  { %4807 = vmatprep.subr.bf16.mxu1 %v4806_v43  ;;  %4839 = vmatprep.subr.bf16.mxu0 %v4838_v45 }
 0xe1d   :  { %4809 = vmatpush3.bf16.msra.mxu1 %v4808_v52  ;;  %4841 = vmatpush3.bf16.msra.mxu0 %v4840_v27 }
 0xe1e   :  { %4811 = vmatprep.subr.bf16.mxu1 %v4810_v2  ;;  %4843 = vmatprep.subr.bf16.mxu0 %v4842_v35 }
 0xe21   :  { %4813 = vmatpush3.bf16.msra.mxu1 %v4812_v44  ;;  %4845 = vmatpush3.bf16.msra.mxu0 %v4844_v48 }
 0xed6   :  { %v3191_v1 = vpop.f32.mrb[30].mxu1  ;;  %v3280_v3 = vpop.f32.mrb[44].mxu0 }
 0xed7   :  { %v3192_v6 = vadd.f32 %v3191_v1, %v3096_v24  ;;  %v3281_v7 = vadd.f32 %v3280_v3, %v3104_v61  ;;  %v3193_v13 = vpop.f32.mrb[31].mxu1  ;;  %v3282_v15 = vpop.f32.mrb[45].mxu0 }
 0xed8   :  { %v3194_v10 = vadd.f32 %v3193_v13, %v3100_v63  ;;  %v3283_v17 = vadd.f32 %v3282_v15, %v3108_v49 }
 0xed9   :  { %v3303_v21 = vmax.f32 %v3192_v6, 0.0  ;;  %v3305_v62 = vmax.f32 %v3281_v7, 0.0 }
 0xeda   :  { %v3304_v18 = vmax.f32 %v3194_v10, 0.0  ;;  %v3306_v19 = vmax.f32 %v3283_v17, 0.0  ;;  %v3197_v58 = vpop.f32.mrb[32].mxu1  ;;  %v3286_v20 = vpop.f32.mrb[46].mxu0  ;;  %v4955_v17 = vld [vmem:[%s5036_s5 + $0x8] sm:$0xff] }
 0xedb   :  { %v3198_v23 = vadd.f32 %v3197_v58, %v3096_v24  ;;  %v3287_v25 = vadd.f32 %v3286_v20, %v3104_v61  ;;  %v3199_v60 = vpop.f32.mrb[33].mxu1  ;;  %v3288_v26 = vpop.f32.mrb[47].mxu0 }
 0xedc   :  { %v3200_v9 = vadd.f32 %v3199_v60, %v3100_v63  ;;  %v3289_v0 = vadd.f32 %v3288_v26, %v3108_v49  ;;  %3454 = vmatprep.mubr.f32.mxu1 %v3304_v18  ;;  %3539 = vmatprep.mubr.f32.mxu0 %v3306_v19  ;;  %v3570_v18 = vmul.f32 %v4955_v17, %v3564_v56 }
 0xedd   :  { %3455 = vmatmul.mubr.f32.vlgmr.msra.gmra.mrb[38].mxu1 %v3303_v21  ;;  %3540 = vmatmul.mubr.f32.vlgmr.msra.gmra.mrb[52].mxu0 %v3305_v62  ;;  %v3307_v31 = vmax.f32 %v3198_v23, 0.0  ;;  %v3309_v5 = vmax.f32 %v3287_v25, 0.0 }
 0xede   :  { %v3308_v28 = vmax.f32 %v3200_v9, 0.0  ;;  %v3310_v8 = vmax.f32 %v3289_v0, 0.0  ;;  %v3203_v29 = vpop.f32.mrb[34].mxu1  ;;  %v3292_v12 = vpop.f32.mrb[48].mxu0  ;;  %v4956_v0 = vld [vmem:[%s5036_s5 + $0x10] sm:$0xff] }
 0xedf   :  { %v3204_v33 = vadd.f32 %v3203_v29, %v3096_v24  ;;  %v3293_v34 = vadd.f32 %v3292_v12, %v3104_v61  ;;  %v3205_v11 = vpop.f32.mrb[35].mxu1  ;;  %v3294_v36 = vpop.f32.mrb[49].mxu0 }
 0xee0   :  { %v3206_v37 = vadd.f32 %v3205_v11, %v3100_v63  ;;  %v3295_v38 = vadd.f32 %v3294_v36, %v3108_v49  ;;  %3459 = vmatprep.mubr.f32.mxu1 %v3308_v28  ;;  %3544 = vmatprep.mubr.f32.mxu0 %v3310_v8  ;;  %v3571_v28 = vmul.f32 %v4956_v0, %v3564_v56 }
 0xee1   :  { %3460 = vmatmul.mubr.f32.gmra.mrb[40].mxu1 %v3307_v31  ;;  %3545 = vmatmul.mubr.f32.gmra.mrb[54].mxu0 %v3309_v5  ;;  %v3311_v50 = vmax.f32 %v3204_v33, 0.0  ;;  %v3313_v42 = vmax.f32 %v3293_v34, 0.0 }
 0xee2   :  { %v3312_v39 = vmax.f32 %v3206_v37, 0.0  ;;  %v3314_v40 = vmax.f32 %v3295_v38, 0.0  ;;  %v3209_v41 = vpop.f32.mrb[36].mxu1  ;;  %v3298_v47 = vpop.f32.mrb[50].mxu0  ;;  %v4957_v38 = vld [vmem:[%s5036_s5 + $0x18] sm:$0xff] }
 0xee3   :  { %v3210_v43 = vadd.f32 %v3209_v41, %v3096_v24  ;;  %v3299_v45 = vadd.f32 %v3298_v47, %v3104_v61  ;;  %v3211_v46 = vpop.f32.mrb[37].mxu1  ;;  %v3300_v51 = vpop.f32.mrb[51].mxu0 }
 0xee4   :  { %v3212_v32 = vadd.f32 %v3211_v46, %v3100_v63  ;;  %v3301_v52 = vadd.f32 %v3300_v51, %v3108_v49  ;;  %3464 = vmatprep.mubr.f32.mxu1 %v3312_v39  ;;  %3549 = vmatprep.mubr.f32.mxu0 %v3314_v40  ;;  %v4954_v63 = vld [vmem:[%s5036_s5] sm:$0xff]  ;;  %v3572_v39 = vmul.f32 %v4957_v38, %v3564_v56  ;;  %s5782_s5 = sld [smem:[#allocation3 + $0x1]] }
 0xee5   :  { %3465 = vmatmul.mubr.f32.gmra.mrb[42].mxu1 %v3311_v50  ;;  %3550 = vmatmul.mubr.f32.gmra.mrb[56].mxu0 %v3313_v42  ;;  %v3315_v53 = vmax.f32 %v3210_v43, 0.0  ;;  %v3317_v54 = vmax.f32 %v3299_v45, 0.0  ;;  %v3569_v49 = vmul.f32 %v4954_v63, %v3564_v56 }
 0xee6   :  { %v3316_v4 = vmax.f32 %v3212_v32, 0.0  ;;  %v3318_v27 = vmax.f32 %v3301_v52, 0.0 }
 0xee8   :  { %3469 = vmatprep.mubr.f32.mxu1 %v3316_v4  ;;  %3554 = vmatprep.mubr.f32.mxu0 %v3318_v27 }
 0xee9   :  { %3470 = vmatmul.mubr.f32.gmra.mrb[44].mxu1 %v3315_v53  ;;  %3555 = vmatmul.mubr.f32.gmra.mrb[58].mxu0 %v3317_v54  ;;  %v3614_v53 = vpop.xlane.xlu0 %3613 }
 0xeea   :  { %v3615_v54 = vrot.slane %v3614_v53, 4 }
 0xfb0   :  { %v4111_v30 = vpop.f32.mrb[38].mxu1  ;;  %v4155_v2 = vpop.f32.mrb[52].mxu0 }
 0xfb1   :  { %v4112_v16 = vpop.f32.mrb[39].mxu1  ;;  %v4156_v22 = vpop.f32.mrb[53].mxu0 }
 0xfb2   :  { %v4113_v35 = vadd.f32 %v4112_v16, %v4111_v30  ;;  %v4157_v44 = vadd.f32 %v4156_v22, %v4155_v2  ;;  %v3616_v30 = vadd.f32 %v3615_v54, %v3614_v53  ;;  %v3624_v2 = vstv %s5782_s5 }
 0xfb4   :  { %v3457_v57 = vadd.f32 %v4113_v35, %v3832_v55  ;;  %v4114_v48 = vpop.f32.mrb[40].mxu1  ;;  %v4158_v59 = vpop.f32.mrb[54].mxu0  ;;  %v3617_v16 = vrot.slane %v3616_v30, 2 }
 0xfb5   :  { %v4115_v24 = vpop.f32.mrb[41].mxu1  ;;  %v4159_v61 = vpop.f32.mrb[55].mxu0 }
 0xfb6   :  { %v3542_v1 = vadd.f32 %v4157_v44, %v3457_v57  ;;  %v4116_v3 = vadd.f32 %v4115_v24, %v4114_v48  ;;  %v4160_v6 = vadd.f32 %v4159_v61, %v4158_v59 }
 0xfb8   :  { %v3565_v7 = vmul.f32 %v3564_v56, %v3542_v1  ;;  %3691 = vst.msk [vmem:[%s5179_s12] sm:$0xff] %vm284_vm3, %v3542_v1  ;;  %v3462_v13 = vadd.f32 %v4116_v3, %v3832_v55  ;;  %v4117_v15 = vpop.f32.mrb[42].mxu1  ;;  %v4161_v10 = vpop.f32.mrb[56].mxu0 }
 0xfb9   :  { %v4118_v19 = vpop.f32.mrb[43].mxu1  ;;  %v4162_v58 = vpop.f32.mrb[57].mxu0 }
 0xfba   :  { %v3573_v20 = vsub.f32 %v3565_v7, %v3569_v49  ;;  %v3547_v21 = vadd.f32 %v4160_v6, %v3462_v13  ;;  %v4119_v62 = vadd.f32 %v4118_v19, %v4117_v15  ;;  %v4163_v23 = vadd.f32 %v4162_v58, %v4161_v10  ;;  %v3631_v3 = vpop.permute.xlu0 %3630 }
 0xfbb   :  { %v3626_v6 = vmul.f32 %v5596_v14, %v5596_v14  ;;  %v3623_v10 = vadd.f32 1.0, %v5596_v14 }
 0xfbc   :  { %v3566_v25 = vmul.f32 %v3564_v56, %v3547_v21  ;;  %3692 = vst.msk [vmem:[%s5179_s12 + $0x8] sm:$0xff] %vm284_vm3, %v3547_v21  ;;  %v3467_v60 = vadd.f32 %v4119_v62, %v3832_v55  ;;  %v4120_v26 = vpop.f32.mrb[44].mxu1  ;;  %v4164_v9 = vpop.f32.mrb[58].mxu0  ;;  %v3577_v8 = vmul.f32 %v3573_v20, %v3573_v20  ;;  %v3662_v21 = vstv %s3834_s1 }
 0xfbd   :  { %v4121_v29 = vpop.f32.mrb[45].mxu1  ;;  %v4165_v12 = vpop.f32.mrb[59].mxu0  ;;  %v3633_v7 = vadd.f32 %v3631_v3, %v3626_v6  ;;  %v3625_v17 = vsub.f32 %v3623_v10, %v3624_v2  ;;  %v3665_v62 = vmul.f32 1.442695, %v3662_v21 }
 0xfbe   :  { %v3574_v31 = vsub.f32 %v3566_v25, %v3570_v18  ;;  %v3552_v5 = vadd.f32 %v4163_v23, %v3467_v60  ;;  %v4122_v33 = vadd.f32 %v4121_v29, %v4120_v26  ;;  %v4166_v34 = vadd.f32 %v4165_v12, %v4164_v9 }
 0xfbf   :  { %v3581_v47 = vsel %vm284_vm3, %v3577_v8, 0.0 }
 0xfc0   :  { %v3578_v11 = vmul.f32 %v3574_v31, %v3574_v31  ;;  %v3567_v36 = vmul.f32 %v3564_v56, %v3552_v5  ;;  %3693 = vst.msk [vmem:[%s5179_s12 + $0x10] sm:$0xff] %vm284_vm3, %v3552_v5  ;;  %v3472_v37 = vadd.f32 %v4122_v33, %v3832_v55  ;;  %v3635_v55 = vmul.f32 1.442695, %v3624_v2 }
 0xfc1   :  { %v3663_v31 = vsub.f32 %v3623_v10, %v3662_v21 }
 0xfc2   :  { %v3575_v40 = vsub.f32 %v3567_v36, %v3571_v28  ;;  %v3557_v41 = vadd.f32 %v4166_v34, %v3472_v37  ;;  %v3582_v50 = vsel %vm284_vm3, %v3578_v11, 0.0  ;;  %4946 = vpow2.f32 %v3635_v55 }
 0xfc3   :  { %v3583_v42 = vadd.f32 %v3582_v50, %v3581_v47 }
 0xfc4   :  { %v3568_v43 = vmul.f32 %v3564_v56, %v3557_v41  ;;  %3694 = vst.msk [vmem:[%s5179_s12 + $0x18] sm:$0xff] %vm284_vm3, %v3557_v41  ;;  %v3579_v45 = vmul.f32 %v3575_v40, %v3575_v40  ;;  %v3618_v56 = vadd.f32 %v3617_v16, %v3616_v30 }
 0xfc6   :  { %v3576_v46 = vsub.f32 %v3568_v43, %v3572_v39  ;;  %v3584_v51 = vsel %vm284_vm3, %v3579_v45, 0.0  ;;  %v3619_v59 = vrot.slane %v3618_v56, 1 }
 0xfc7   :  { %v3585_v32 = vadd.f32 %v3584_v51, %v3583_v42 }
 0xfc8   :  { %v3580_v52 = vmul.f32 %v3576_v46, %v3576_v46  ;;  %v3620_v49 = vadd.f32 %v3619_v59, %v3618_v56 }
 0xfca   :  { %v3586_v4 = vsel %vm284_vm3, %v3580_v52, 0.0  ;;  %vm3650_vm3 = vcmask 3072  }
 0xfcb   :  { %v3587_v27 = vadd.f32 %v3586_v4, %v3585_v32 }
 0xfcc   :  { %v4947_v63 = vpop.eup %4946 }
 0xfcd   :  { %3588 = vadd.xlane.f32.xlu1 %v3587_v27 }
0x105a   :  { %v3589_v22 = vpop.xlane.xlu1 %3588 }
0x105b   :  { %v3590_v35 = vrot.slane %v3589_v22, 4 }
0x105d   :  { %v3591_v44 = vadd.f32 %v3590_v35, %v3589_v22 }
0x105f   :  { %v3592_v57 = vrot.slane %v3591_v44, 2 }
0x1061   :  { %v3593_v48 = vadd.f32 %v3592_v57, %v3591_v44 }
0x1063   :  { %v3594_v24 = vrot.slane %v3593_v48, 1 }
0x1065   :  { %v3595_v61 = vadd.f32 %v3594_v24, %v3593_v48 }
0x1067   :  { %4850 = vpush %v3595_v61 }
0x1068   :  { %4852 = vpush %v3620_v49 }
0x1069   :  { %4854 = vpush %v4947_v63 }
0x1098   :  { %s5785_s12 = spop %4850 }
0x1099   :  { %s5787_s23 = spop %4852 }
0x109a   :  { %s4855_s22 = spop %4854  ;;  %s3622_s28 = smul.f32 -0.5, %s5787_s23 }
0x109b   :  { %v3638_v1 = vstv %s4855_s22 }
0x109c   :  { %4948 = vrcp.f32 %v3638_v1 }
0x109d   :  { %4950 = vpow2.f32 %v3665_v62 }
0x10a6   :  { %v4949_v13 = vpop.eup %4948 }
0x10a7   :  { %v3640_v15 = vmul.f32 %v4949_v13, %v3633_v7  ;;  %v4951_v0 = vpop.eup %4950 }
0x10a9   :  { %3642 = vrot.lane.b32.xlu1 %v3640_v15, %s5026_s26 }
0x111b   :  { %v3643_v18 = vpop.permute.xlu1 %3642 }
0x111c   :  { %v3645_v19 = vsub.f32 %v3625_v17, %v3643_v18 }
0x111e   :  { %3647 = vrot.lane.b32.xlu1 %v3645_v19, %s5020_s19 }
0x1190   :  { %v3648_v58 = vpop.permute.xlu1 %3647 }
0x1191   :  { %v3651_v20 = vsel %vm3650_vm3, %v3648_v58, 0.0 }
0x1192   :  { %3652 = vadd.xlane.f32.xlu0 %v3651_v20 }
0x121f   :  { %v3653_v23 = vpop.xlane.xlu0 %3652 }
0x1220   :  { %v3654_v25 = vrot.slane %v3653_v23, 4 }
0x1222   :  { %v3655_v60 = vadd.f32 %v3654_v25, %v3653_v23 }
0x1224   :  { %v3656_v26 = vrot.slane %v3655_v60, 2 }
0x1226   :  { %v3657_v14 = vadd.f32 %v3656_v26, %v3655_v60 }
0x1228   :  { %v3658_v9 = vrot.slane %v3657_v14, 1 }
0x122a   :  { %v3659_v28 = vadd.f32 %v3658_v9, %v3657_v14 }
0x122c   :  { %4856 = vpush %v3659_v28 }
0x122d   :  { %4858 = vpush %v4951_v0 }
0x125d   :  { %s4857_s2 = spop %4856 }
0x125e   :  { %s3661_s0 = smul.f32 -0.5, %s4857_s2  ;;  %s4859_s9 = spop %4858 }
0x125f   :  { %v3668_v8 = vstv %s4859_s9 }
0x1260   :  { %s3699_s17 = sadd.f32 %s3661_s0, %s3622_s28  ;;  %4952 = vrcp.f32 %v3668_v8 }
0x126a   :  { %v4953_v29 = vpop.eup %4952 }
0x126b   :  { %v3670_v12 = vmul.f32 %v4953_v29, %v3633_v7 }
0x126d   :  { %3672 = vrot.lane.b32.xlu1 %v3670_v12, %s5026_s26 }
0x12df   :  { %v3673_v5 = vpop.permute.xlu1 %3672 }
0x12e0   :  { %v3675_v33 = vsub.f32 %v3663_v31, %v3673_v5 }
0x12e2   :  { %3677 = vrot.lane.b32.xlu1 %v3675_v33, %s5021_s24  ;;  %s4970_s24 = scalar_lea.hbm %s5194_s20, 16 }
0x12e3   :  { %p4971_p5 = scmp.ne.s32.totalorder %s5194_s20, %s4970_s24  ;;  %p4974_p6 = scmp.lt.u32.totalorder %s4970_s24, %s5194_s20 }
0x12e5   :  { %p4976_p7 = pnand %p4974_p6, %p4971_p5 }
0x1354   :  { %v3678_v34 = vpop.permute.xlu1 %3677 }
0x1355   :  { %v3680_v11 = vsel %vm3650_vm3, %v3678_v34, 0.0 }
0x1356   :  { %3681 = vadd.xlane.f32.xlu1 %v3680_v11 }
0x13e3   :  { %v3682_v36 = vpop.xlane.xlu1 %3681 }
0x13e4   :  { %v3683_v37 = vrot.slane %v3682_v36, 4 }
0x13e6   :  { %v3684_v38 = vadd.f32 %v3683_v37, %v3682_v36 }
0x13e8   :  { %v3685_v39 = vrot.slane %v3684_v38, 2 }
0x13ea   :  { %v3686_v40 = vadd.f32 %v3685_v39, %v3684_v38 }
0x13ec   :  { %v3687_v41 = vrot.slane %v3686_v40, 1 }
0x13ee   :  { %v3688_v47 = vadd.f32 %v3687_v41, %v3686_v40 }
0x13f0   :  { %4860 = vpush %v3688_v47 }
0x1421   :  { %s4861_s25 = spop %4860 }
0x1422   :  { %s3690_s29 = smul.f32 -0.5, %s4861_s25 }
0x1424   :  { %s3700_s3 = sadd.f32 %s3699_s17, %s3690_s29 }
0x1426   :  { %s3701_s8 = smul.f32 %s3835_s21, %s3700_s3 }
0x1428   :  { %s3702_s14 = sadd.f32 %s5785_s12, %s3701_s8 }
0x142a   :  { %s3705_s19 = smul.f32 0.25, %s3702_s14 }
0x142c   :  { %3707 = sst [smem:[#allocation6]] %s3705_s19 }
0x142d   :  { %4979 = shalt.err (!%p4976_p7)
}
0x142e   :  { %s5027_s13 = smov [#allocation6]  }
0x142f   :  { %3721 = dma.smem_to_hbm %s5027_s13, 16, %s5194_s20, [#allocation4]  }
0x1430   :  { %4982 = dma.done.wait [#allocation4], 16  }
0x1431   :  { %4983 = vsyncadd [#allocation4], 4294967280 }
0x1432   :  { %3731 = sfence }
0x1433   :  { %3732 = vsyncpa [#allocation4], 1 }
0x1434   :  { %3733 = vsyncpa [#allocation5], 1 }

</bundles_post_ra>
